<compile_context>
chip_gen: v5e
topology: v5e:2x2
jax: 0.10.0
libtpu: 0.0.40
codegen_flags: <defaults>
</compile_context>

<pallas_src>
import math

import jax
import jax.numpy as jnp
from jax import lax
from jax.experimental import pallas as pl
from jax.experimental.pallas import tpu as pltpu


_NEG_BIG = 1e9
_VMEM_LIMIT = 32 * 1024 * 1024  # safe scoped-VMEM request on v5e/v6e/v7x


def _pick_tile(n, cap):
    """Largest multiple-of-8 divisor of n that is <= cap, else the full dim."""
    for t in (1024, 512, 256, 128, 64, 32, 16, 8):
        if t <= cap and t <= n and n % t == 0:
            return t
    return n  # full dim is always a legal block size


# ----------------------------------------------------------------------------
# Kernel 1: block-of-rows attention over one shared per-batch key/value set.
#   q_src block (Mb, Hin) -> q = q_src @ Wq   (fused, Wq already scaled)
#   k, v        (Nk, Dh)                      shared by all rows of this batch
#   bias        (1, Nk)                       additive key mask ((m-1)*1e9)
#   wo          (Dh, Dout)                    fused output projection
#   rmask       (Mb, 1)                       query-row validity mask
#   out block   (Mb, Dout)
# Used for self node->node (rows = nodes) and node->edge (rows = N*N edges).
# ----------------------------------------------------------------------------
def _rows_attn_kernel(qsrc_ref, wq_ref, k_ref, v_ref, bias_ref, wo_ref,
                      rmask_ref, o_ref):
    qsrc = qsrc_ref[0]                      # (Mb, Hin) bf16
    k = k_ref[0]                            # (Nk, Dh)  bf16
    v = v_ref[0]                            # (Nk, Dh)  bf16
    bias = bias_ref[0]                      # (1, Nk)   f32
    rmask = rmask_ref[0]                    # (Mb, 1)   f32

    # Fused (scaled) query projection.
    q = jnp.dot(qsrc, wq_ref[...], preferred_element_type=jnp.float32)  # (Mb,Dh)

    # Contract the last dims directly -> no k.T materialization / relayout.
    s = lax.dot_general(q.astype(jnp.bfloat16), k, (((1,), (1,)), ((), ())),
                        preferred_element_type=jnp.float32)             # (Mb,Nk)
    s = s + bias
    s_max = jnp.max(s, axis=-1, keepdims=True)
    p = jnp.exp(s - s_max)
    denom = jnp.sum(p, axis=-1, keepdims=True)

    o = jnp.dot(p.astype(jnp.bfloat16), v,
                preferred_element_type=jnp.float32)                     # (Mb,Dh)
    # Fold softmax normalization into the narrow (Mb, Dh) result (EUP recip).
    o = o * pl.reciprocal(denom, approx=True)

    y = jnp.dot(o.astype(jnp.bfloat16), wo_ref[...],
                preferred_element_type=jnp.float32)                     # (Mb,Dout)
    o_ref[0] = (y * rmask).astype(o_ref.dtype)


def _rows_attention(q_src, wq_eff, k, v, bias, wo, row_mask):
    """q_src [B,M,Hin], k/v [B,Nk,Dh], bias [B,1,Nk], wo [Dh,Dout],
       row_mask [B,M,1]  ->  [B,M,Dout] (f32)."""
    B, M, Hin = q_src.shape
    Nk, Dh = k.shape[1], k.shape[2]
    Dout = wo.shape[1]

    # Rough per-row VMEM footprint (double-buffered bf16 in, f32 scores, f32 out).
    per_row_bytes = Hin * 4 + Nk * 8 + Dh * 4 + Dout * 8
    cap = max(8, (8 * 1024 * 1024) // max(per_row_bytes, 1))
    Mb = _pick_tile(M, min(cap, 512))
    grid = (B, M // Mb)

    return pl.pallas_call(
        _rows_attn_kernel,
        out_shape=jax.ShapeDtypeStruct((B, M, Dout), jnp.float32),
        grid=grid,
        in_specs=[
            pl.BlockSpec((1, Mb, Hin), lambda b, m: (b, m, 0)),
            pl.BlockSpec((Hin, Dh), lambda b, m: (0, 0)),
            pl.BlockSpec((1, Nk, Dh), lambda b, m: (b, 0, 0)),
            pl.BlockSpec((1, Nk, Dh), lambda b, m: (b, 0, 0)),
            pl.BlockSpec((1, 1, Nk), lambda b, m: (b, 0, 0)),
            pl.BlockSpec((Dh, Dout), lambda b, m: (0, 0)),
            pl.BlockSpec((1, Mb, 1), lambda b, m: (b, m, 0)),
        ],
        out_specs=pl.BlockSpec((1, Mb, Dout), lambda b, m: (b, m, 0)),
        compiler_params=pltpu.CompilerParams(
            dimension_semantics=("parallel", "parallel"),
            vmem_limit_bytes=_VMEM_LIMIT),
    )(q_src.astype(jnp.bfloat16), wq_eff.astype(jnp.bfloat16),
      k.astype(jnp.bfloat16), v.astype(jnp.bfloat16),
      bias.astype(jnp.float32), wo.astype(jnp.bfloat16),
      row_mask.astype(jnp.float32))


# ----------------------------------------------------------------------------
# Kernel 2: edge->node attention.  Each query node i has its own key/value set
# built from the edge slab e[b, i, :, :].  Algebraically fused so the kernel
# contracts scores and values directly against e (no per-query K/V tensors):
#   r block   (Nb, H)       r = x @ (Wq Wk^T) * scale   (precomputed)
#   e block   (Nb, Nk, H)   raw edge slab (bf16)
#   bias      (1, Nk)       additive key mask
#   wvo       (H, Dout)     Wv @ Wo fused
#   rmask     (Nb, 1)
#   out block (Nb, Dout)
# ----------------------------------------------------------------------------
def _e2n_attn_kernel(r_ref, e_ref, bias_ref, wvo_ref, rmask_ref, o_ref):
    r = r_ref[0].astype(jnp.float32)        # (Nb, H)
    ef = e_ref[0].astype(jnp.float32)       # (Nb, Nk, H)
    bias = bias_ref[0]                      # (1, Nk)   f32
    rmask = rmask_ref[0]                    # (Nb, 1)   f32

    # Per-query key sets: VPU broadcast-multiply + lane reduce over H
    # (a (1,Dh)x(Dh,Nk) MXU matmul per query row would underfill the array).
    s = jnp.sum(ef * r[:, None, :], axis=-1) + bias          # (Nb, Nk)
    s_max = jnp.max(s, axis=-1, keepdims=True)
    p = jnp.exp(s - s_max)
    denom = jnp.sum(p, axis=-1, keepdims=True)

    # Softmax-weighted sum of raw edge rows (sublane reduce), then one small
    # MXU matmul with the fused (H, Dout) value/output projection.
    c = jnp.sum(ef * p[:, :, None], axis=1)                  # (Nb, H)
    c = c * pl.reciprocal(denom, approx=True)

    y = jnp.dot(c.astype(jnp.bfloat16), wvo_ref[...],
                preferred_element_type=jnp.float32)          # (Nb, Dout)
    o_ref[0] = (y * rmask).astype(o_ref.dtype)


def _edge_keys_attention(r, e, bias, wvo, row_mask):
    """r [B,N,H], e [B,N,N,H], bias [B,1,N], wvo [H,Dout], row_mask [B,N,1]
       ->  [B,N,Dout] (f32)."""
    B, N, H = r.shape
    Dout = wvo.shape[1]

    # Budget the e slab: bf16 block x2 buffers + f32 in-kernel copy/products.
    per_node_bytes = N * H * (2 * 2 + 4 + 4)
    cap = max(8, (8 * 1024 * 1024) // max(per_node_bytes, 1))
    Nb = _pick_tile(N, min(cap, 256))
    grid = (B, N // Nb)

    return pl.pallas_call(
        _e2n_attn_kernel,
        out_shape=jax.ShapeDtypeStruct((B, N, Dout), jnp.float32),
        grid=grid,
        in_specs=[
            pl.BlockSpec((1, Nb, H), lambda b, i: (b, i, 0)),
            pl.BlockSpec((1, Nb, N, H), lambda b, i: (b, i, 0, 0)),
            pl.BlockSpec((1, 1, N), lambda b, i: (b, 0, 0)),
            pl.BlockSpec((H, Dout), lambda b, i: (0, 0)),
            pl.BlockSpec((1, Nb, 1), lambda b, i: (b, i, 0)),
        ],
        out_specs=pl.BlockSpec((1, Nb, Dout), lambda b, i: (b, i, 0)),
        compiler_params=pltpu.CompilerParams(
            dimension_semantics=("parallel", "parallel"),
            vmem_limit_bytes=_VMEM_LIMIT),
    )(r.astype(jnp.bfloat16), e.astype(jnp.bfloat16),
      bias.astype(jnp.float32), wvo.astype(jnp.bfloat16),
      row_mask.astype(jnp.float32))


# ----------------------------------------------------------------------------
# The three dense attention sub-layers (shrink projections composed with
# Q/K/V projections into single H->head_dim matrices; tiny JAX glue only).
# ----------------------------------------------------------------------------
def self_attention_node_to_node_dense(params, x, e, node_mask):
    Dh = params['wq'].shape[1]
    scale = 1.0 / math.sqrt(Dh)
    wq_eff = (params['w_shrink_node'] @ params['wq']) * scale
    wk_eff = params['w_shrink_node'] @ params['wk']
    wv_eff = params['w_shrink_node'] @ params['wv']
    k = jnp.einsum('bnh,hd->bnd', x, wk_eff)
    v = jnp.einsum('bnh,hd->bnd', x, wv_eff)
    bias = ((node_mask - 1.0) * _NEG_BIG)[:, None, :]
    rmask = node_mask[..., None]
    x_new = _rows_attention(x, wq_eff, k, v, bias, params['wo'], rmask)
    return x_new, e


def attention_edge_to_node_dense(params, x, e, node_mask):
    Dh = params['wq'].shape[1]
    scale = 1.0 / math.sqrt(Dh)
    wq_eff = params['w_shrink_node'] @ params['wq']
    wk_eff = params['w_shrink_edge'] @ params['wk']
    wv_eff = params['w_shrink_edge'] @ params['wv']
    # Fusion: (x Wq).(e Wk) == e.(x Wq Wk^T); softmax(p)@(e Wv)@Wo == (p@e)@(Wv Wo)
    wqk = (wq_eff * scale) @ wk_eff.T                        # (H, H)
    r = jnp.einsum('bnh,hg->bng', x, wqk)                    # (B, N, H)
    wvo = wv_eff @ params['wo']                              # (H, Hout)
    bias = ((node_mask - 1.0) * _NEG_BIG)[:, None, :]
    rmask = node_mask[..., None]
    x_new = _edge_keys_attention(r, e, bias, wvo, rmask)
    return x_new, e


def attention_node_to_edge_dense(params, x, e, node_mask):
    B, N, _ = x.shape
    Dh = params['wq'].shape[1]
    scale = 1.0 / math.sqrt(Dh)
    wq_eff = (params['w_shrink_edge'] @ params['wq']) * scale
    wk_eff = params['w_shrink_node'] @ params['wk']
    wv_eff = params['w_shrink_node'] @ params['wv']
    k = jnp.einsum('bnh,hd->bnd', x, wk_eff)
    v = jnp.einsum('bnh,hd->bnd', x, wv_eff)
    bias = ((node_mask - 1.0) * _NEG_BIG)[:, None, :]
    emask = (node_mask[:, :, None] * node_mask[:, None, :]).reshape(B, N * N, 1)
    e_flat = e.reshape(B, N * N, e.shape[-1])
    e_new = _rows_attention(e_flat, wq_eff, k, v, bias, params['wo'], emask)
    return x, e_new.reshape(B, N, N, e_new.shape[-1])


_LAYER_FNS = {
    'self_attention_node_to_node': self_attention_node_to_node_dense,
    'cross_attention_edge_to_node': attention_edge_to_node_dense,
    'cross_attention_node_to_edge': attention_node_to_edge_dense,
}


# ----------------------------------------------------------------------------
# Deterministic parameter initialization (synthetic — no checkpoint load)
# ----------------------------------------------------------------------------
def _init_weight(key, fan_in, fan_out):
    return (jax.random.normal(key, (fan_in, fan_out), jnp.float32)
            / jnp.sqrt(jnp.float32(fan_in)))


def init_attention_head_params(key, layers, hidden_dim, head_dim):
    params = []
    for li, layer in enumerate(layers):
        lk = jax.random.fold_in(key, li)
        s_n = layer['shrink_node_dim']
        s_e = layer['shrink_edge_dim']
        atype = layer['attention_type']
        p = {}
        p['w_shrink_node'] = _init_weight(jax.random.fold_in(lk, 0), hidden_dim, s_n)
        p['w_shrink_edge'] = _init_weight(jax.random.fold_in(lk, 1), hidden_dim, s_e)
        if atype == 'self_attention_node_to_node':
            q_in, kv_in = s_n, s_n
        elif atype == 'cross_attention_edge_to_node':
            q_in, kv_in = s_n, s_e
        elif atype == 'cross_attention_node_to_edge':
            q_in, kv_in = s_e, s_n
        else:
            raise NotImplementedError(atype)
        p['wq'] = _init_weight(jax.random.fold_in(lk, 2), q_in, head_dim)
        p['wk'] = _init_weight(jax.random.fold_in(lk, 3), kv_in, head_dim)
        p['wv'] = _init_weight(jax.random.fold_in(lk, 4), kv_in, head_dim)
        p['wo'] = _init_weight(jax.random.fold_in(lk, 5), head_dim, hidden_dim)
        params.append(p)
    return params


# ----------------------------------------------------------------------------
# Attention_Head_GTv3 forward (container semantics)
# ----------------------------------------------------------------------------
def attention_head_gtv3_forward(params, layers, x, e, node_mask):
    node_feature_list = [x]
    edge_feature_list = [e]
    for idx, layer in enumerate(layers):
        fn = _LAYER_FNS[layer['attention_type']]
        x_in = node_feature_list[layer['used_node_feature_idx']]
        e_in = edge_feature_list[layer['used_edge_feature_idx']]
        x_layer, e_layer = fn(params[idx], x_in, e_in, node_mask)
        node_feature_list.append(x_layer)
        edge_feature_list.append(e_layer)
    return node_feature_list[-1], edge_feature_list[-1]
    # (torch.cuda.empty_cache() has no JAX equivalent / is a no-op here)


if __name__ == "__main__":
    B, N = 2, 8
    hidden_dim, head_dim = 32, 16
    layers = [
        {'attention_type': 'self_attention_node_to_node',
         'used_node_feature_idx': 0, 'used_edge_feature_idx': 0,
         'shrink_node_dim': 16, 'shrink_edge_dim': 16},
        {'attention_type': 'cross_attention_edge_to_node',
         'used_node_feature_idx': 1, 'used_edge_feature_idx': 0,
         'shrink_node_dim': 16, 'shrink_edge_dim': 16},
        {'attention_type': 'cross_attention_node_to_edge',
         'used_node_feature_idx': 2, 'used_edge_feature_idx': 0,
         'shrink_node_dim': 16, 'shrink_edge_dim': 16},
    ]

    root = jax.random.PRNGKey(0)
    kx, ke, kp = jax.random.split(root, 3)
    x = jax.random.normal(kx, (B, N, hidden_dim), jnp.float32)
    e = jax.random.normal(ke, (B, N, N, hidden_dim), jnp.float32)
    # batch 0: all 8 nodes valid; batch 1: only first 6 valid
    node_mask = jnp.stack([
        jnp.ones((N,), jnp.float32),
        (jnp.arange(N) < 6).astype(jnp.float32),
    ], axis=0)

    params = init_attention_head_params(kp, layers, hidden_dim, head_dim)

    forward = jax.jit(
        lambda p, xx, ee, mm: attention_head_gtv3_forward(p, layers, xx, ee, mm))
    final_node, final_edge = forward(params, x, e, node_mask)
    jax.block_until_ready((final_node, final_edge))

    assert final_node.shape == (B, N, hidden_dim)
    assert final_edge.shape == (B, N, N, hidden_dim)
    assert bool(jnp.all(jnp.isfinite(final_node)))
    assert bool(jnp.all(jnp.isfinite(final_edge)))
    print("KERNEL_OK")
</pallas_src>

<mosaic_0001>
module attributes {stable_mosaic.version = 11 : i64} {
  func.func @_rows_attn_kernel(%arg0: i32, %arg1: i32, %arg2: memref<1x8x32xbf16, #tpu.memory_space<vmem>>, %arg3: memref<32x16xbf16, #tpu.memory_space<vmem>>, %arg4: memref<1x8x16xbf16, #tpu.memory_space<vmem>>, %arg5: memref<1x8x16xbf16, #tpu.memory_space<vmem>>, %arg6: memref<1x1x8xf32, #tpu.memory_space<vmem>>, %arg7: memref<16x32xbf16, #tpu.memory_space<vmem>>, %arg8: memref<1x8x1xf32, #tpu.memory_space<vmem>>, %arg9: memref<1x8x32xf32, #tpu.memory_space<vmem>>) attributes {dimension_semantics = [#tpu.dimension_semantics<parallel>, #tpu.dimension_semantics<parallel>], iteration_bounds = array<i64: 2, 1>, scalar_prefetch = 0 : i64, scratch_operands = 0 : i64, tpu.core_type = #tpu.core_type<tc>, window_params = [{transform_indices = @transform_0, window_bounds = array<i64: 1, 8, 32>}, {pipeline_mode = #tpu.pipeline_mode<synchronous>, transform_indices = @transform_1, window_bounds = array<i64: 32, 16>}, {transform_indices = @transform_2, window_bounds = array<i64: 1, 8, 16>}, {transform_indices = @transform_3, window_bounds = array<i64: 1, 8, 16>}, {transform_indices = @transform_4, window_bounds = array<i64: 1, 1, 8>}, {pipeline_mode = #tpu.pipeline_mode<synchronous>, transform_indices = @transform_5, window_bounds = array<i64: 16, 32>}, {transform_indices = @transform_6, window_bounds = array<i64: 1, 8, 1>}, {transform_indices = @transform_7, window_bounds = array<i64: 1, 8, 32>}]} {
    %c0 = arith.constant 0 : index
    %c0_0 = arith.constant 0 : index
    %c0_1 = arith.constant 0 : index
    %0 = vector.load %arg2[%c0, %c0_0, %c0_1] : memref<1x8x32xbf16, #tpu.memory_space<vmem>>, vector<1x8x32xbf16>
    %1 = vector.shape_cast %0 : vector<1x8x32xbf16> to vector<8x32xbf16>
    %c0_2 = arith.constant 0 : index
    %c0_3 = arith.constant 0 : index
    %c0_4 = arith.constant 0 : index
    %2 = vector.load %arg4[%c0_2, %c0_3, %c0_4] : memref<1x8x16xbf16, #tpu.memory_space<vmem>>, vector<1x8x16xbf16>
    %3 = vector.shape_cast %2 : vector<1x8x16xbf16> to vector<8x16xbf16>
    %c0_5 = arith.constant 0 : index
    %c0_6 = arith.constant 0 : index
    %c0_7 = arith.constant 0 : index
    %4 = vector.load %arg5[%c0_5, %c0_6, %c0_7] : memref<1x8x16xbf16, #tpu.memory_space<vmem>>, vector<1x8x16xbf16>
    %5 = vector.shape_cast %4 : vector<1x8x16xbf16> to vector<8x16xbf16>
    %c0_8 = arith.constant 0 : index
    %c0_9 = arith.constant 0 : index
    %c0_10 = arith.constant 0 : index
    %6 = vector.load %arg6[%c0_8, %c0_9, %c0_10] : memref<1x1x8xf32, #tpu.memory_space<vmem>>, vector<1x1x8xf32>
    %7 = vector.shape_cast %6 : vector<1x1x8xf32> to vector<1x8xf32>
    %c0_11 = arith.constant 0 : index
    %c0_12 = arith.constant 0 : index
    %c0_13 = arith.constant 0 : index
    %8 = vector.load %arg8[%c0_11, %c0_12, %c0_13] : memref<1x8x1xf32, #tpu.memory_space<vmem>>, vector<1x8x1xf32>
    %9 = vector.shape_cast %8 : vector<1x8x1xf32> to vector<8x1xf32>
    %c0_14 = arith.constant 0 : index
    %c0_15 = arith.constant 0 : index
    %10 = vector.load %arg3[%c0_14, %c0_15] : memref<32x16xbf16, #tpu.memory_space<vmem>>, vector<32x16xbf16>
    %cst = arith.constant dense<0.000000e+00> : vector<8x16xf32>
    %11 = tpu.matmul %1, %10, %cst {dimension_numbers = #tpu.dot_dimension_numbers<[1], [0], [0], [1], [0, 0, 1, 1], [], []>} : vector<8x32xbf16>, vector<32x16xbf16>, vector<8x16xf32> -> vector<8x16xf32>
    %12 = arith.truncf %11 : vector<8x16xf32> to vector<8x16xbf16>
    %cst_16 = arith.constant dense<0.000000e+00> : vector<8x8xf32>
    %13 = tpu.matmul %12, %3, %cst_16 {dimension_numbers = #tpu.dot_dimension_numbers<[1], [1], [0], [0], [0, 0, 1, 0], [], []>} : vector<8x16xbf16>, vector<8x16xbf16>, vector<8x8xf32> -> vector<8x8xf32>
    %14 = vector.broadcast %7 : vector<1x8xf32> to vector<8x8xf32>
    %15 = arith.addf %13, %14 : vector<8x8xf32>
    %cst_17 = arith.constant dense<0xFF800000> : vector<8xf32>
    %16 = vector.multi_reduction <maximumf>, %15, %cst_17 [1] : vector<8x8xf32> to vector<8xf32>
    %17 = vector.shape_cast %16 : vector<8xf32> to vector<8x1xf32>
    %18 = vector.broadcast %17 : vector<8x1xf32> to vector<8x8xf32>
    %19 = arith.subf %15, %18 : vector<8x8xf32>
    %20 = math.exp %19 : vector<8x8xf32>
    %cst_18 = arith.constant dense<0.000000e+00> : vector<8xf32>
    %21 = vector.multi_reduction <add>, %20, %cst_18 [1] : vector<8x8xf32> to vector<8xf32>
    %22 = vector.shape_cast %21 : vector<8xf32> to vector<8x1xf32>
    %23 = arith.truncf %20 : vector<8x8xf32> to vector<8x8xbf16>
    %cst_19 = arith.constant dense<0.000000e+00> : vector<8x16xf32>
    %24 = tpu.matmul %23, %5, %cst_19 {dimension_numbers = #tpu.dot_dimension_numbers<[1], [0], [0], [1], [0, 0, 1, 1], [], []>} : vector<8x8xbf16>, vector<8x16xbf16>, vector<8x16xf32> -> vector<8x16xf32>
    %25 = tpu.reciprocal %22 {approx = true} : vector<8x1xf32> -> vector<8x1xf32>
    %26 = vector.broadcast %25 : vector<8x1xf32> to vector<8x16xf32>
    %27 = arith.mulf %24, %26 : vector<8x16xf32>
    %28 = arith.truncf %27 : vector<8x16xf32> to vector<8x16xbf16>
    %c0_20 = arith.constant 0 : index
    %c0_21 = arith.constant 0 : index
    %29 = vector.load %arg7[%c0_20, %c0_21] : memref<16x32xbf16, #tpu.memory_space<vmem>>, vector<16x32xbf16>
    %cst_22 = arith.constant dense<0.000000e+00> : vector<8x32xf32>
    %30 = tpu.matmul %28, %29, %cst_22 {dimension_numbers = #tpu.dot_dimension_numbers<[1], [0], [0], [1], [0, 0, 1, 1], [], []>} : vector<8x16xbf16>, vector<16x32xbf16>, vector<8x32xf32> -> vector<8x32xf32>
    %31 = vector.broadcast %9 : vector<8x1xf32> to vector<8x32xf32>
    %32 = arith.mulf %30, %31 : vector<8x32xf32>
    %c0_23 = arith.constant 0 : index
    %c0_24 = arith.constant 0 : index
    %c0_25 = arith.constant 0 : index
    %33 = vector.load %arg9[%c0_23, %c0_24, %c0_25] : memref<1x8x32xf32, #tpu.memory_space<vmem>>, vector<1x8x32xf32>
    %34 = vector.shape_cast %33 : vector<1x8x32xf32> to vector<8x32xf32>
    %35 = vector.shape_cast %32 : vector<8x32xf32> to vector<1x8x32xf32>
    tpu.vector_store %arg9[%c0_23, %c0_24, %c0_25], %35 {strides = array<i32>} : memref<1x8x32xf32, #tpu.memory_space<vmem>>, vector<1x8x32xf32>,
    return
  }
  func.func @transform_0(%arg0: i32, %arg1: i32) -> (i32, i32, i32) {
    %c0_i32 = arith.constant 0 : i32
    %c0_i32_0 = arith.constant 0 : i32
    return %arg0, %arg1, %c0_i32 : i32, i32, i32
  }
  func.func @transform_1(%arg0: i32, %arg1: i32) -> (i32, i32) {
    %c0_i32 = arith.constant 0 : i32
    %c0_i32_0 = arith.constant 0 : i32
    %c0_i32_1 = arith.constant 0 : i32
    return %c0_i32, %c0_i32_0 : i32, i32
  }
  func.func @transform_2(%arg0: i32, %arg1: i32) -> (i32, i32, i32) {
    %c0_i32 = arith.constant 0 : i32
    %c0_i32_0 = arith.constant 0 : i32
    %c0_i32_1 = arith.constant 0 : i32
    return %arg0, %c0_i32, %c0_i32_0 : i32, i32, i32
  }
  func.func @transform_3(%arg0: i32, %arg1: i32) -> (i32, i32, i32) {
    %c0_i32 = arith.constant 0 : i32
    %c0_i32_0 = arith.constant 0 : i32
    %c0_i32_1 = arith.constant 0 : i32
    return %arg0, %c0_i32, %c0_i32_0 : i32, i32, i32
  }
  func.func @transform_4(%arg0: i32, %arg1: i32) -> (i32, i32, i32) {
    %c0_i32 = arith.constant 0 : i32
    %c0_i32_0 = arith.constant 0 : i32
    %c0_i32_1 = arith.constant 0 : i32
    return %arg0, %c0_i32, %c0_i32_0 : i32, i32, i32
  }
  func.func @transform_5(%arg0: i32, %arg1: i32) -> (i32, i32) {
    %c0_i32 = arith.constant 0 : i32
    %c0_i32_0 = arith.constant 0 : i32
    %c0_i32_1 = arith.constant 0 : i32
    return %c0_i32, %c0_i32_0 : i32, i32
  }
  func.func @transform_6(%arg0: i32, %arg1: i32) -> (i32, i32, i32) {
    %c0_i32 = arith.constant 0 : i32
    %c0_i32_0 = arith.constant 0 : i32
    return %arg0, %arg1, %c0_i32 : i32, i32, i32
  }
  func.func @transform_7(%arg0: i32, %arg1: i32) -> (i32, i32, i32) {
    %c0_i32 = arith.constant 0 : i32
    %c0_i32_0 = arith.constant 0 : i32
    return %arg0, %arg1, %c0_i32 : i32, i32, i32
  }
}

module attributes {stable_mosaic.version = 11 : i64} {
  func.func @_e2n_attn_kernel(%arg0: i32, %arg1: i32, %arg2: memref<1x8x32xbf16, #tpu.memory_space<vmem>>, %arg3: memref<1x8x8x32xbf16, #tpu.memory_space<vmem>>, %arg4: memref<1x1x8xf32, #tpu.memory_space<vmem>>, %arg5: memref<32x32xbf16, #tpu.memory_space<vmem>>, %arg6: memref<1x8x1xf32, #tpu.memory_space<vmem>>, %arg7: memref<1x8x32xf32, #tpu.memory_space<vmem>>) attributes {dimension_semantics = [#tpu.dimension_semantics<parallel>, #tpu.dimension_semantics<parallel>], iteration_bounds = array<i64: 2, 1>, scalar_prefetch = 0 : i64, scratch_operands = 0 : i64, tpu.core_type = #tpu.core_type<tc>, window_params = [{transform_indices = @transform_0, window_bounds = array<i64: 1, 8, 32>}, {transform_indices = @transform_1, window_bounds = array<i64: 1, 8, 8, 32>}, {transform_indices = @transform_2, window_bounds = array<i64: 1, 1, 8>}, {pipeline_mode = #tpu.pipeline_mode<synchronous>, transform_indices = @transform_3, window_bounds = array<i64: 32, 32>}, {transform_indices = @transform_4, window_bounds = array<i64: 1, 8, 1>}, {transform_indices = @transform_5, window_bounds = array<i64: 1, 8, 32>}]} {
    %c0 = arith.constant 0 : index
    %c0_0 = arith.constant 0 : index
    %c0_1 = arith.constant 0 : index
    %0 = vector.load %arg2[%c0, %c0_0, %c0_1] : memref<1x8x32xbf16, #tpu.memory_space<vmem>>, vector<1x8x32xbf16>
    %1 = vector.shape_cast %0 : vector<1x8x32xbf16> to vector<8x32xbf16>
    %2 = arith.extf %1 : vector<8x32xbf16> to vector<8x32xf32>
    %c0_2 = arith.constant 0 : index
    %c0_3 = arith.constant 0 : index
    %c0_4 = arith.constant 0 : index
    %c0_5 = arith.constant 0 : index
    %3 = vector.load %arg3[%c0_2, %c0_3, %c0_4, %c0_5] : memref<1x8x8x32xbf16, #tpu.memory_space<vmem>>, vector<1x8x8x32xbf16>
    %4 = vector.shape_cast %3 : vector<1x8x8x32xbf16> to vector<8x8x32xbf16>
    %5 = arith.extf %4 : vector<8x8x32xbf16> to vector<8x8x32xf32>
    %c0_6 = arith.constant 0 : index
    %c0_7 = arith.constant 0 : index
    %c0_8 = arith.constant 0 : index
    %6 = vector.load %arg4[%c0_6, %c0_7, %c0_8] : memref<1x1x8xf32, #tpu.memory_space<vmem>>, vector<1x1x8xf32>
    %7 = vector.shape_cast %6 : vector<1x1x8xf32> to vector<1x8xf32>
    %c0_9 = arith.constant 0 : index
    %c0_10 = arith.constant 0 : index
    %c0_11 = arith.constant 0 : index
    %8 = vector.load %arg6[%c0_9, %c0_10, %c0_11] : memref<1x8x1xf32, #tpu.memory_space<vmem>>, vector<1x8x1xf32>
    %9 = vector.shape_cast %8 : vector<1x8x1xf32> to vector<8x1xf32>
    %10 = vector.shape_cast %2 : vector<8x32xf32> to vector<8x1x32xf32>
    %11 = vector.broadcast %10 : vector<8x1x32xf32> to vector<8x8x32xf32>
    %12 = arith.mulf %5, %11 : vector<8x8x32xf32>
    %cst = arith.constant dense<0.000000e+00> : vector<8x8xf32>
    %13 = vector.multi_reduction <add>, %12, %cst [2] : vector<8x8x32xf32> to vector<8x8xf32>
    %14 = vector.broadcast %7 : vector<1x8xf32> to vector<8x8xf32>
    %15 = arith.addf %13, %14 : vector<8x8xf32>
    %cst_12 = arith.constant dense<0xFF800000> : vector<8xf32>
    %16 = vector.multi_reduction <maximumf>, %15, %cst_12 [1] : vector<8x8xf32> to vector<8xf32>
    %17 = vector.shape_cast %16 : vector<8xf32> to vector<8x1xf32>
    %18 = vector.broadcast %17 : vector<8x1xf32> to vector<8x8xf32>
    %19 = arith.subf %15, %18 : vector<8x8xf32>
    %20 = math.exp %19 : vector<8x8xf32>
    %cst_13 = arith.constant dense<0.000000e+00> : vector<8xf32>
    %21 = vector.multi_reduction <add>, %20, %cst_13 [1] : vector<8x8xf32> to vector<8xf32>
    %22 = vector.shape_cast %21 : vector<8xf32> to vector<8x1xf32>
    %23 = vector.shape_cast %20 : vector<8x8xf32> to vector<8x8x1xf32>
    %24 = vector.broadcast %23 : vector<8x8x1xf32> to vector<8x8x32xf32>
    %25 = arith.mulf %5, %24 : vector<8x8x32xf32>
    %cst_14 = arith.constant dense<0.000000e+00> : vector<8x32xf32>
    %26 = vector.multi_reduction <add>, %25, %cst_14 [1] : vector<8x8x32xf32> to vector<8x32xf32>
    %27 = tpu.reciprocal %22 {approx = true} : vector<8x1xf32> -> vector<8x1xf32>
    %28 = vector.broadcast %27 : vector<8x1xf32> to vector<8x32xf32>
    %29 = arith.mulf %26, %28 : vector<8x32xf32>
    %30 = arith.truncf %29 : vector<8x32xf32> to vector<8x32xbf16>
    %c0_15 = arith.constant 0 : index
    %c0_16 = arith.constant 0 : index
    %31 = vector.load %arg5[%c0_15, %c0_16] : memref<32x32xbf16, #tpu.memory_space<vmem>>, vector<32x32xbf16>
    %cst_17 = arith.constant dense<0.000000e+00> : vector<8x32xf32>
    %32 = tpu.matmul %30, %31, %cst_17 {dimension_numbers = #tpu.dot_dimension_numbers<[1], [0], [0], [1], [0, 0, 1, 1], [], []>} : vector<8x32xbf16>, vector<32x32xbf16>, vector<8x32xf32> -> vector<8x32xf32>
    %33 = vector.broadcast %9 : vector<8x1xf32> to vector<8x32xf32>
    %34 = arith.mulf %32, %33 : vector<8x32xf32>
    %c0_18 = arith.constant 0 : index
    %c0_19 = arith.constant 0 : index
    %c0_20 = arith.constant 0 : index
    %35 = vector.load %arg7[%c0_18, %c0_19, %c0_20] : memref<1x8x32xf32, #tpu.memory_space<vmem>>, vector<1x8x32xf32>
    %36 = vector.shape_cast %35 : vector<1x8x32xf32> to vector<8x32xf32>
    %37 = vector.shape_cast %34 : vector<8x32xf32> to vector<1x8x32xf32>
    tpu.vector_store %arg7[%c0_18, %c0_19, %c0_20], %37 {strides = array<i32>} : memref<1x8x32xf32, #tpu.memory_space<vmem>>, vector<1x8x32xf32>,
    return
  }
  func.func @transform_0(%arg0: i32, %arg1: i32) -> (i32, i32, i32) {
    %c0_i32 = arith.constant 0 : i32
    %c0_i32_0 = arith.constant 0 : i32
    return %arg0, %arg1, %c0_i32 : i32, i32, i32
  }
  func.func @transform_1(%arg0: i32, %arg1: i32) -> (i32, i32, i32, i32) {
    %c0_i32 = arith.constant 0 : i32
    %c0_i32_0 = arith.constant 0 : i32
    %c0_i32_1 = arith.constant 0 : i32
    return %arg0, %arg1, %c0_i32, %c0_i32_0 : i32, i32, i32, i32
  }
  func.func @transform_2(%arg0: i32, %arg1: i32) -> (i32, i32, i32) {
    %c0_i32 = arith.constant 0 : i32
    %c0_i32_0 = arith.constant 0 : i32
    %c0_i32_1 = arith.constant 0 : i32
    return %arg0, %c0_i32, %c0_i32_0 : i32, i32, i32
  }
  func.func @transform_3(%arg0: i32, %arg1: i32) -> (i32, i32) {
    %c0_i32 = arith.constant 0 : i32
    %c0_i32_0 = arith.constant 0 : i32
    %c0_i32_1 = arith.constant 0 : i32
    return %c0_i32, %c0_i32_0 : i32, i32
  }
  func.func @transform_4(%arg0: i32, %arg1: i32) -> (i32, i32, i32) {
    %c0_i32 = arith.constant 0 : i32
    %c0_i32_0 = arith.constant 0 : i32
    return %arg0, %arg1, %c0_i32 : i32, i32, i32
  }
  func.func @transform_5(%arg0: i32, %arg1: i32) -> (i32, i32, i32) {
    %c0_i32 = arith.constant 0 : i32
    %c0_i32_0 = arith.constant 0 : i32
    return %arg0, %arg1, %c0_i32 : i32, i32, i32
  }
}

module attributes {stable_mosaic.version = 11 : i64} {
  func.func @_rows_attn_kernel(%arg0: i32, %arg1: i32, %arg2: memref<1x64x32xbf16, #tpu.memory_space<vmem>>, %arg3: memref<32x16xbf16, #tpu.memory_space<vmem>>, %arg4: memref<1x8x16xbf16, #tpu.memory_space<vmem>>, %arg5: memref<1x8x16xbf16, #tpu.memory_space<vmem>>, %arg6: memref<1x1x8xf32, #tpu.memory_space<vmem>>, %arg7: memref<16x32xbf16, #tpu.memory_space<vmem>>, %arg8: memref<1x64x1xf32, #tpu.memory_space<vmem>>, %arg9: memref<1x64x32xf32, #tpu.memory_space<vmem>>) attributes {dimension_semantics = [#tpu.dimension_semantics<parallel>, #tpu.dimension_semantics<parallel>], iteration_bounds = array<i64: 2, 1>, scalar_prefetch = 0 : i64, scratch_operands = 0 : i64, tpu.core_type = #tpu.core_type<tc>, window_params = [{transform_indices = @transform_0, window_bounds = array<i64: 1, 64, 32>}, {pipeline_mode = #tpu.pipeline_mode<synchronous>, transform_indices = @transform_1, window_bounds = array<i64: 32, 16>}, {transform_indices = @transform_2, window_bounds = array<i64: 1, 8, 16>}, {transform_indices = @transform_3, window_bounds = array<i64: 1, 8, 16>}, {transform_indices = @transform_4, window_bounds = array<i64: 1, 1, 8>}, {pipeline_mode = #tpu.pipeline_mode<synchronous>, transform_indices = @transform_5, window_bounds = array<i64: 16, 32>}, {transform_indices = @transform_6, window_bounds = array<i64: 1, 64, 1>}, {transform_indices = @transform_7, window_bounds = array<i64: 1, 64, 32>}]} {
    %c0 = arith.constant 0 : index
    %c0_0 = arith.constant 0 : index
    %c0_1 = arith.constant 0 : index
    %0 = vector.load %arg2[%c0, %c0_0, %c0_1] : memref<1x64x32xbf16, #tpu.memory_space<vmem>>, vector<1x64x32xbf16>
    %1 = vector.shape_cast %0 : vector<1x64x32xbf16> to vector<64x32xbf16>
    %c0_2 = arith.constant 0 : index
    %c0_3 = arith.constant 0 : index
    %c0_4 = arith.constant 0 : index
    %2 = vector.load %arg4[%c0_2, %c0_3, %c0_4] : memref<1x8x16xbf16, #tpu.memory_space<vmem>>, vector<1x8x16xbf16>
    %3 = vector.shape_cast %2 : vector<1x8x16xbf16> to vector<8x16xbf16>
    %c0_5 = arith.constant 0 : index
    %c0_6 = arith.constant 0 : index
    %c0_7 = arith.constant 0 : index
    %4 = vector.load %arg5[%c0_5, %c0_6, %c0_7] : memref<1x8x16xbf16, #tpu.memory_space<vmem>>, vector<1x8x16xbf16>
    %5 = vector.shape_cast %4 : vector<1x8x16xbf16> to vector<8x16xbf16>
    %c0_8 = arith.constant 0 : index
    %c0_9 = arith.constant 0 : index
    %c0_10 = arith.constant 0 : index
    %6 = vector.load %arg6[%c0_8, %c0_9, %c0_10] : memref<1x1x8xf32, #tpu.memory_space<vmem>>, vector<1x1x8xf32>
    %7 = vector.shape_cast %6 : vector<1x1x8xf32> to vector<1x8xf32>
    %c0_11 = arith.constant 0 : index
    %c0_12 = arith.constant 0 : index
    %c0_13 = arith.constant 0 : index
    %8 = vector.load %arg8[%c0_11, %c0_12, %c0_13] : memref<1x64x1xf32, #tpu.memory_space<vmem>>, vector<1x64x1xf32>
    %9 = vector.shape_cast %8 : vector<1x64x1xf32> to vector<64x1xf32>
    %c0_14 = arith.constant 0 : index
    %c0_15 = arith.constant 0 : index
    %10 = vector.load %arg3[%c0_14, %c0_15] : memref<32x16xbf16, #tpu.memory_space<vmem>>, vector<32x16xbf16>
    %cst = arith.constant dense<0.000000e+00> : vector<64x16xf32>
    %11 = tpu.matmul %1, %10, %cst {dimension_numbers = #tpu.dot_dimension_numbers<[1], [0], [0], [1], [0, 0, 1, 1], [], []>} : vector<64x32xbf16>, vector<32x16xbf16>, vector<64x16xf32> -> vector<64x16xf32>
    %12 = arith.truncf %11 : vector<64x16xf32> to vector<64x16xbf16>
    %cst_16 = arith.constant dense<0.000000e+00> : vector<64x8xf32>
    %13 = tpu.matmul %12, %3, %cst_16 {dimension_numbers = #tpu.dot_dimension_numbers<[1], [1], [0], [0], [0, 0, 1, 0], [], []>} : vector<64x16xbf16>, vector<8x16xbf16>, vector<64x8xf32> -> vector<64x8xf32>
    %14 = vector.broadcast %7 : vector<1x8xf32> to vector<64x8xf32>
    %15 = arith.addf %13, %14 : vector<64x8xf32>
    %cst_17 = arith.constant dense<0xFF800000> : vector<64xf32>
    %16 = vector.multi_reduction <maximumf>, %15, %cst_17 [1] : vector<64x8xf32> to vector<64xf32>
    %17 = vector.shape_cast %16 : vector<64xf32> to vector<64x1xf32>
    %18 = vector.broadcast %17 : vector<64x1xf32> to vector<64x8xf32>
    %19 = arith.subf %15, %18 : vector<64x8xf32>
    %20 = math.exp %19 : vector<64x8xf32>
    %cst_18 = arith.constant dense<0.000000e+00> : vector<64xf32>
    %21 = vector.multi_reduction <add>, %20, %cst_18 [1] : vector<64x8xf32> to vector<64xf32>
    %22 = vector.shape_cast %21 : vector<64xf32> to vector<64x1xf32>
    %23 = arith.truncf %20 : vector<64x8xf32> to vector<64x8xbf16>
    %cst_19 = arith.constant dense<0.000000e+00> : vector<64x16xf32>
    %24 = tpu.matmul %23, %5, %cst_19 {dimension_numbers = #tpu.dot_dimension_numbers<[1], [0], [0], [1], [0, 0, 1, 1], [], []>} : vector<64x8xbf16>, vector<8x16xbf16>, vector<64x16xf32> -> vector<64x16xf32>
    %25 = tpu.reciprocal %22 {approx = true} : vector<64x1xf32> -> vector<64x1xf32>
    %26 = vector.broadcast %25 : vector<64x1xf32> to vector<64x16xf32>
    %27 = arith.mulf %24, %26 : vector<64x16xf32>
    %28 = arith.truncf %27 : vector<64x16xf32> to vector<64x16xbf16>
    %c0_20 = arith.constant 0 : index
    %c0_21 = arith.constant 0 : index
    %29 = vector.load %arg7[%c0_20, %c0_21] : memref<16x32xbf16, #tpu.memory_space<vmem>>, vector<16x32xbf16>
    %cst_22 = arith.constant dense<0.000000e+00> : vector<64x32xf32>
    %30 = tpu.matmul %28, %29, %cst_22 {dimension_numbers = #tpu.dot_dimension_numbers<[1], [0], [0], [1], [0, 0, 1, 1], [], []>} : vector<64x16xbf16>, vector<16x32xbf16>, vector<64x32xf32> -> vector<64x32xf32>
    %31 = vector.broadcast %9 : vector<64x1xf32> to vector<64x32xf32>
    %32 = arith.mulf %30, %31 : vector<64x32xf32>
    %c0_23 = arith.constant 0 : index
    %c0_24 = arith.constant 0 : index
    %c0_25 = arith.constant 0 : index
    %33 = vector.load %arg9[%c0_23, %c0_24, %c0_25] : memref<1x64x32xf32, #tpu.memory_space<vmem>>, vector<1x64x32xf32>
    %34 = vector.shape_cast %33 : vector<1x64x32xf32> to vector<64x32xf32>
    %35 = vector.shape_cast %32 : vector<64x32xf32> to vector<1x64x32xf32>
    tpu.vector_store %arg9[%c0_23, %c0_24, %c0_25], %35 {strides = array<i32>} : memref<1x64x32xf32, #tpu.memory_space<vmem>>, vector<1x64x32xf32>,
    return
  }
  func.func @transform_0(%arg0: i32, %arg1: i32) -> (i32, i32, i32) {
    %c0_i32 = arith.constant 0 : i32
    %c0_i32_0 = arith.constant 0 : i32
    return %arg0, %arg1, %c0_i32 : i32, i32, i32
  }
  func.func @transform_1(%arg0: i32, %arg1: i32) -> (i32, i32) {
    %c0_i32 = arith.constant 0 : i32
    %c0_i32_0 = arith.constant 0 : i32
    %c0_i32_1 = arith.constant 0 : i32
    return %c0_i32, %c0_i32_0 : i32, i32
  }
  func.func @transform_2(%arg0: i32, %arg1: i32) -> (i32, i32, i32) {
    %c0_i32 = arith.constant 0 : i32
    %c0_i32_0 = arith.constant 0 : i32
    %c0_i32_1 = arith.constant 0 : i32
    return %arg0, %c0_i32, %c0_i32_0 : i32, i32, i32
  }
  func.func @transform_3(%arg0: i32, %arg1: i32) -> (i32, i32, i32) {
    %c0_i32 = arith.constant 0 : i32
    %c0_i32_0 = arith.constant 0 : i32
    %c0_i32_1 = arith.constant 0 : i32
    return %arg0, %c0_i32, %c0_i32_0 : i32, i32, i32
  }
  func.func @transform_4(%arg0: i32, %arg1: i32) -> (i32, i32, i32) {
    %c0_i32 = arith.constant 0 : i32
    %c0_i32_0 = arith.constant 0 : i32
    %c0_i32_1 = arith.constant 0 : i32
    return %arg0, %c0_i32, %c0_i32_0 : i32, i32, i32
  }
  func.func @transform_5(%arg0: i32, %arg1: i32) -> (i32, i32) {
    %c0_i32 = arith.constant 0 : i32
    %c0_i32_0 = arith.constant 0 : i32
    %c0_i32_1 = arith.constant 0 : i32
    return %c0_i32, %c0_i32_0 : i32, i32
  }
  func.func @transform_6(%arg0: i32, %arg1: i32) -> (i32, i32, i32) {
    %c0_i32 = arith.constant 0 : i32
    %c0_i32_0 = arith.constant 0 : i32
    return %arg0, %arg1, %c0_i32 : i32, i32, i32
  }
  func.func @transform_7(%arg0: i32, %arg1: i32) -> (i32, i32, i32) {
    %c0_i32 = arith.constant 0 : i32
    %c0_i32_0 = arith.constant 0 : i32
    return %arg0, %arg1, %c0_i32 : i32, i32, i32
  }
}

</mosaic_0001>

<bundles_post_ra>
// kernel: _lambda_.3
= control target key start
LH: loop header
LB: loop body
LE: loop exit
PB: predicated region body
PF: predicated region fallthrough
CT: control target
= control target key end

     0   :  { %s759_s24 = smov 0   ;;  %s761_s25 = smov 0   ;;  %s826_s0 = inlined_call_operand.vmem [shape: bf16[2,8,32], index: 0, kind: input, shape index: {}]   ;;  %s827_s1 = inlined_call_operand.vmem [shape: bf16[32,16], index: 1, kind: input, shape index: {}]   ;;  %s828_s2 = inlined_call_operand.vmem [shape: bf16[2,8,16], index: 2, kind: input, shape index: {}]   ;;  %s829_s3 = inlined_call_operand.vmem [shape: bf16[2,8,16], index: 3, kind: input, shape index: {}]   ;;  %s830_s4 = inlined_call_operand.vmem [shape: f32[2,1,8], index: 4, kind: input, shape index: {}]   ;;  %s831_s5 = inlined_call_operand.vmem [shape: bf16[16,32], index: 5, kind: input, shape index: {}]   ;;  %s832_s6 = inlined_call_operand.vmem [shape: f32[2,8,1], index: 6, kind: input, shape index: {}]   ;;  %s833_s7 = inlined_call_operand.vmem [shape: f32[2,8,32], index: 7, kind: output, shape index: {}]  }
   0x1   :  { %s763_s26 = smov 0  }
   0x2 LB: > { %s29_s27 = sadd.s32 1, %s712_s25  ;;  %p635_p0 = scmp.ge.s32.totalorder %s716_s26, 1  ;;  %s716_s26 = sphi %s763_s26, %s17_s26   ;;  %s712_s25 = sphi %s761_s25, %s835_s25   ;;  %s708_s24 = sphi %s759_s24, %s834_s24  }
   0x3   : > { %p31_p1 = scmp.ge.s32.totalorder %s29_s27, 2  ;;  %p295_p2 = scmp.lt.s32.totalorder %s716_s26, 3 }
   0x5   : > { %s837_s27 = smov (%p31_p1, %s29_s27), 0  ;;  %p296_p3 = pnand %p635_p0, %p295_p2 }
   0x6   : > { %p349_p4 = scmp.lt.s32.totalorder (!%p296_p3), %s708_s24, 1 }
   0x7   : > { %299 = sbr.rel (%p296_p3) target bundleno = 682 (0x2aa), region = 48 }
   0xc   : > { %v660_v0 = vld [vmem:[%s827_s1 + $0x8] sm:$0xff]  ;;  %v659_v1 = vld [vmem:[%s827_s1] sm:$0xff]  ;;  %s839_s24 = smov (!%p349_p4, %s708_s24), 1  ;;  %vm424_vm0 = vcmask 130048   ;;  %vm403_vm1 = vcmask 261120   ;;  %vm444_vm2 = vcmask 64512  }
   0xd   : > { %413 = vmatpush.bf16.msra.mxu0 %v660_v0  ;;  %s636_s9 = sshll.u32 %s839_s24, 2  ;;  %s366_s18 = scalar_lea.vmem %s830_s4, %s839_s24  ;;  %vm458_vm3 = vcmask 1043456   ;;  %v661_v21 = vld [vmem:[%s831_s5] sm:$0xff]  ;;  %v718_v23 = vmov 0  }
   0xe   : > { %s355_s12 = scalar_lea.vmem %s826_s0, %s636_s9  ;;  %s359_s15 = scalar_lea.vmem %s828_s2, %s636_s9  ;;  %v689_v8 = vld [vmem:[%s366_s18] ss:$0 sm:$0xff]  ;;  %496 = vmatpush.bf16.msra.mxu3 %v661_v21  ;;  %687 = vset.pattern.permute.xlu1 %v718_v23 }
   0xf   : > { %v382_v2 = vld [vmem:[%s355_s12] sm:$0xf]  ;;  %s363_s21 = scalar_lea.vmem %s829_s3, %s636_s9  ;;  %s639_s28 = sshll.u32 %s839_s24, 3  ;;  %688 = vset.pattern.permute.xlu0 %v718_v23 }
  0x10   : > { %v383_v3 = vld [vmem:[%s359_s15] sm:$0xf]  ;;  %s373_s8 = scalar_lea.vmem %s832_s6, %s639_s28  ;;  %s380_s10 = scalar_lea.vmem %s833_s7, %s639_s28 }
  0x11   : > { %414 = vmatpush.bf16.msra.mxu0 %v659_v1  ;;  %v429_v4 = vsel %vm424_vm0, %v383_v3, 0  ;;  %v384_v13 = vld [vmem:[%s363_s21] sm:$0xf] }
  0x12   : > { %438 = vmatpush.bf16.xpose.msra.mxu1 %v429_v4  ;;  %v460_v14 = vsel %vm458_vm3, %v384_v13, 0  ;;  %v386_v22 = vld [vmem:[%s373_s8] sm:$0xff] }
  0x13   : > { %469 = vmatpush.bf16.msra.mxu2 %v460_v14  ;;  %504 = vperm.xlu1 %687, %v386_v22  }
  0x14   : > { %649 = vmatmul.msk.bf16.vlgmr.msra.gmra.mxu0 %vm403_vm1, %v382_v2 }
  0x85   : > { %v505_v30 = vpop.permute.xlu1 %504 }
  0x91   : > { %v416_v5 = vpop.f32.mrf.mxu0 }
  0x92   : > { %v420_v6 = vpack.c.bf16 %v416_v5, %v416_v5 }
  0x94   : > { %650 = vmatmul.msk.bf16.vlgmr.msra.gmra.mxu1 %vm424_vm0, %v420_v6 }
  0x99   : > { %v418_v7 = vpop.f32.mrf.mxu0 }
 0x111   : > { %v440_v9 = vpop.f32.mrf.mxu1 }
 0x112   : > { %v441_v10 = vadd.f32 %v689_v8, %v440_v9 }
 0x114   : > { %v445_v11 = vsel %vm444_vm2, %v441_v10, -inf }
 0x115   : > { %446 = vmax.xlane.f32.xlu0 %v445_v11 }
 0x119   : > { %v442_v12 = vpop.f32.mrf.mxu1 }
 0x188   : > { %v447_v15 = vpop.xlane.xlu0 %446 }
 0x189   : > { %v448_v16 = vsub.f32 %v441_v10, %v447_v15 }
 0x18b   : > { %v449_v17 = vmul.f32 1.442695, %v448_v16 }
 0x18d   : > { %690 = vpow2.f32 %v449_v17 }
 0x193   : > { %v691_v18 = vpop.eup %690 }
 0x194   : > { %v451_v19 = vsel %vm444_vm2, %v691_v18, 0.0  ;;  %v454_v20 = vpack.c.bf16 %v691_v18, %v691_v18 }
 0x195   : > { %452 = vadd.xlane.f32.xlu0 %v451_v19 }
 0x196   : > { %651 = vmatmul.msk.bf16.vlgmr.msra.gmra.mxu2 %vm444_vm2, %v454_v20 }
 0x208   : > { %v453_v24 = vpop.xlane.xlu0 %452 }
 0x209   : > { %692 = vrcp.f32 %v453_v24 }
 0x20f   : > { %v693_v25 = vpop.eup %692 }
 0x219   : > { %v471_v26 = vpop.f32.mrf.mxu2 }
 0x21a   : > { %v476_v27 = vmul.f32 %v693_v25, %v471_v26 }
 0x21c   : > { %v477_v28 = vpack.c.bf16 %v476_v27, %v476_v27 }
 0x21e   : > { %656 = vmatmul.msk.bf16.vlgmr.msra.gmra.mxu3 %vm424_vm0, %v477_v28 }
 0x221   : > { %v473_v29 = vpop.f32.mrf.mxu2 }
 0x2a1   : > { %v498_v31 = vpop.f32.mrf.mxu3 }
 0x2a2   : > { %v507_v32 = vmul.f32 %v505_v30, %v498_v31 }
 0x2a4   : > { %508 = vst.msk [vmem:[%s380_s10] sm:$0xff] %vm403_vm1, %v507_v32 }
 0x2a9   : > { %v500_v33 = vpop.f32.mrf.mxu3 }
 0x2aa PF: > { %s17_s26 = sadd.s32 1, %s716_s26   ;;  %s834_s24 = smov %s712_s25 }
 0x2ab   : > { %p14_p5 = scmp.ge.s32.totalorder %s17_s26, 4   ;;  %s835_s25 = smov %s837_s27 }
 0x2ad   :  { %16 = sbr.rel (!%p14_p5) target bundleno = 2 (0x2), region = 90 }

// kernel: _lambda_.4
= control target key start
LH: loop header
LB: loop body
LE: loop exit
PB: predicated region body
PF: predicated region fallthrough
CT: control target
= control target key end

     0   :  { %s1014_s18 = smov 0   ;;  %s1016_s19 = smov 0   ;;  %s1208_s0 = inlined_call_operand.vmem [shape: bf16[2,8,32], index: 0, kind: input, shape index: {}]   ;;  %s1209_s1 = inlined_call_operand.vmem [shape: bf16[2,8,8,32], index: 1, kind: input, shape index: {}]   ;;  %s1210_s2 = inlined_call_operand.vmem [shape: f32[2,1,8], index: 2, kind: input, shape index: {}]   ;;  %s1211_s3 = inlined_call_operand.vmem [shape: bf16[32,32], index: 3, kind: input, shape index: {}]   ;;  %s1212_s4 = inlined_call_operand.vmem [shape: f32[2,8,1], index: 4, kind: input, shape index: {}]   ;;  %s1213_s5 = inlined_call_operand.vmem [shape: f32[2,8,32], index: 5, kind: output, shape index: {}]  }
   0x1   :  { %s1018_s20 = smov 0  }
   0x2 LB: > { %s27_s21 = sadd.s32 1, %s977_s19  ;;  %p872_p0 = scmp.ge.s32.totalorder %s981_s20, 1  ;;  %s981_s20 = sphi %s1018_s20, %s15_s20   ;;  %s977_s19 = sphi %s1016_s19, %s1215_s19   ;;  %s973_s18 = sphi %s1014_s18, %s1214_s18  }
   0x3   : > { %p29_p1 = scmp.ge.s32.totalorder %s27_s21, 2  ;;  %p244_p2 = scmp.lt.s32.totalorder %s981_s20, 3 }
   0x5   : > { %s1217_s21 = smov (%p29_p1, %s27_s21), 0  ;;  %p245_p3 = pnand %p872_p0, %p244_p2 }
   0x6   : > { %p295_p4 = scmp.lt.s32.totalorder (!%p245_p3), %s973_s18, 1 }
   0x7   : > { %248 = sbr.rel (%p245_p3) target bundleno = 860 (0x35c), region = 40 }
   0xc   : > { %v409_v0 = vlaneseq  ;;  %s1219_s18 = smov (!%p295_p4, %s973_s18), 1  ;;  %vm382_vm0 = vcmask 261120   ;;  %v983_v48 = vmov 0   ;;  %vm466_vm1 = vcmask 1041409  }
   0xd   : > { %s873_s22 = sshll.u32 %s1219_s18, 2  ;;  %s889_s23 = sshll.u32 %s1219_s18, 5  ;;  %938 = vset.pattern.permute.xlu0 %v983_v48  ;;  %937 = vset.pattern.permute.xlu2 %v983_v48  ;;  %vm468_vm2 = vcmask 1042434   ;;  %vm470_vm3 = vcmask 1043459   ;;  %vm472_vm4 = vcmask 1044484   ;;  %vm474_vm5 = vcmask 1045509  }
   0xe   : > { %v410_v1 = vshrl.u32 %v409_v0, 7  ;;  %s301_s26 = scalar_lea.vmem %s1208_s0, %s873_s22  ;;  %s1043_s29 = scalar_lea.vmem %s1209_s1, %s889_s23  ;;  %vm476_vm6 = vcmask 1046534   ;;  %vm478_vm7 = vcmask 1047559   ;;  %vm481_vm8 = vcmask 64512  }
   0xf   : > { %v330_v2 = vld [vmem:[%s301_s26] sm:$0xf]  ;;  %v1049_v4 = vld [vmem:[%s1043_s29 + $0x8] sm:$0xff]   ;;  %s314_s7 = scalar_lea.vmem %s1210_s2, %s1219_s18  ;;  %v1059_v13 = vld [vmem:[%s1043_s29 + $0x10] sm:$0xff]   ;;  %s876_s10 = sshll.u32 %s1219_s18, 3 }
  0x10   : > { %936 = vset.pattern.permute.xlu1 %v410_v1  ;;  %v1046_v3 = vld [vmem:[%s1043_s29] sm:$0xff]   ;;  %v331_v5 = vunpack.c.l.bf16 %v330_v2  ;;  %v898_v7 = vunpack.c.l.bf16 %v1049_v4  ;;  %v899_v8 = vunpack.c.h.bf16 %v1049_v4  ;;  %v902_v20 = vunpack.c.l.bf16 %v1059_v13  ;;  %v1077_v31 = vld [vmem:[%s1043_s29 + $0x18] sm:$0xff]   ;;  %s321_s13 = scalar_lea.vmem %s1212_s4, %s876_s10  ;;  %s328_s24 = scalar_lea.vmem %s1213_s5, %s876_s10 }
  0x11   : > { %v894_v6 = vunpack.c.l.bf16 %v1046_v3  ;;  %v895_v14 = vunpack.c.h.bf16 %v1046_v3  ;;  %v903_v33 = vunpack.c.h.bf16 %v1059_v13  ;;  %v906_v36 = vunpack.c.l.bf16 %v1077_v31  ;;  %v940_v47 = vld [vmem:[%s314_s7] ss:$0 sm:$0xff] }
  0x12   : > { %v358_v9 = vperm.slane %v331_v5, 0  ;;  %v352_v10 = vrot.slane %v331_v5, 2  ;;  %v353_v11 = vrot.slane %v331_v5, 3  ;;  %v351_v12 = vrot.slane %v331_v5, 1 }
  0x13   : > { %v354_v15 = vrot.slane %v331_v5, 4  ;;  %v355_v28 = vrot.slane %v331_v5, 5  ;;  %v356_v30 = vrot.slane %v331_v5, 6  ;;  %v357_v39 = vrot.slane %v331_v5, 7 }
  0x14   : > { %v374_v16 = vmul.f32 %v894_v6, %v358_v9  ;;  %v360_v17 = vperm.slane %v352_v10, 0  ;;  %v361_v18 = vperm.slane %v353_v11, 0  ;;  %v359_v19 = vperm.slane %v351_v12, 0 }
  0x15   : > { %v362_v24 = vperm.slane %v354_v15, 0  ;;  %v363_v34 = vperm.slane %v355_v28, 0  ;;  %v364_v37 = vperm.slane %v356_v30, 0  ;;  %v907_v42 = vunpack.c.h.bf16 %v1077_v31 }
  0x16   : > { %v383_v21 = vsel %vm382_vm0, %v374_v16, 0.0  ;;  %v376_v22 = vmul.f32 %v898_v7, %v360_v17  ;;  %v377_v23 = vmul.f32 %v899_v8, %v361_v18  ;;  %v375_v27 = vmul.f32 %v895_v14, %v359_v19 }
  0x17   : > { %384 = vadd.xlane.f32.xlu0 %v383_v21  ;;  %v378_v29 = vmul.f32 %v902_v20, %v362_v24  ;;  %v379_v38 = vmul.f32 %v903_v33, %v363_v34  ;;  %v380_v40 = vmul.f32 %v906_v36, %v364_v37  ;;  %v365_v43 = vperm.slane %v357_v39, 0 }
  0x18   : > { %v389_v25 = vsel %vm382_vm0, %v376_v22, 0.0  ;;  %v392_v26 = vsel %vm382_vm0, %v377_v23, 0.0  ;;  %v386_v32 = vsel %vm382_vm0, %v375_v27, 0.0  ;;  %v1111_v12 = vand.u32 127, %v409_v0 }
  0x19   : > { %390 = vadd.xlane.f32.xlu1 %v389_v25  ;;  %393 = vadd.xlane.f32.xlu2 %v392_v26  ;;  %v395_v35 = vsel %vm382_vm0, %v378_v29, 0.0  ;;  %v398_v41 = vsel %vm382_vm0, %v379_v38, 0.0  ;;  %v401_v44 = vsel %vm382_vm0, %v380_v40, 0.0  ;;  %v381_v45 = vmul.f32 %v907_v42, %v365_v43 }
  0x1b   : > { %v404_v46 = vsel %vm382_vm0, %v381_v45, 0.0 }
  0x1f   : > { %387 = vadd.xlane.f32.xlu0 %v386_v32 }
  0x21   : > { %396 = vadd.xlane.f32.xlu2 %v395_v35 }
  0x27   : > { %399 = vadd.xlane.f32.xlu0 %v398_v41 }
  0x29   : > { %402 = vadd.xlane.f32.xlu2 %v401_v44 }
  0x2f   : > { %405 = vadd.xlane.f32.xlu0 %v404_v46 }
  0x32   : > { %413 = vperm.xlu1 %936, %v940_v47  }
  0x3a   : > { %939 = vset.pattern.permute.xlu1 %v983_v48 }
  0x8a   : > { %v385_v49 = vpop.xlane.xlu0 %384 }
  0x8c   : > { %v391_v50 = vpop.xlane.xlu1 %390  ;;  %v394_v51 = vpop.xlane.xlu2 %393 }
  0x92   : > { %v388_v52 = vpop.xlane.xlu0 %387 }
  0x94   : > { %v397_v57 = vpop.xlane.xlu2 %396 }
  0x9a   : > { %v400_v60 = vpop.xlane.xlu0 %399 }
  0x9c   : > { %v403_v61 = vpop.xlane.xlu2 %402 }
  0xa2   : > { %v406_v1 = vpop.xlane.xlu0 %405 }
  0xa4   : > { %v414_v53 = vpop.permute.xlu1 %413 }
  0xa5   : > { %v1098_v54 = vadd.f32 %v414_v53, %v391_v50  ;;  %v416_v55 = vadd.f32 %v414_v53, %v385_v49  ;;  %v417_v56 = vadd.f32 %v414_v53, %v388_v52  ;;  %v419_v58 = vadd.f32 %v414_v53, %v394_v51 }
  0xa6   : > { %v1101_v59 = vadd.f32 %v414_v53, %v397_v57  ;;  %v1104_v62 = vadd.f32 %v414_v53, %v403_v61  ;;  %v421_v63 = vadd.f32 %v414_v53, %v400_v60  ;;  %v1107_v2 = vadd.f32 %v414_v53, %v406_v1 }
  0xa7   : > { %439 = vperm.xlu1 %939, %v1098_v54   ;;  %433 = vperm.xlu2 %937, %v416_v55  }
  0xa8   : > { %436 = vperm.xlu0 %938, %v417_v56  }
  0xaf   : > { %442 = vperm.xlu1 %939, %v419_v58   ;;  %445 = vperm.xlu2 %937, %v1101_v59  }
  0xb7   : > { %451 = vperm.xlu2 %937, %v1104_v62   ;;  %448 = vperm.xlu1 %939, %v421_v63  }
  0xbf   : > { %454 = vperm.xlu1 %939, %v1107_v2  }
 0x101   : > { %v434_v9 = vpop.permute.xlu2 %433 }
 0x102   : > { %v458_v17 = vperm.slane %v434_v9, %v1111_v12 }
 0x109   : > { %v446_v15 = vpop.permute.xlu2 %445 }
 0x10a   : > { %v462_v25 = vperm.slane %v446_v15, %v1111_v12 }
 0x111   : > { %v452_v26 = vpop.permute.xlu2 %451 }
 0x112   : > { %v464_v29 = vperm.slane %v452_v26, %v1111_v12 }
 0x119   : > { %v440_v5 = vpop.permute.xlu1 %439 }
 0x11a   : > { %v437_v10 = vpop.permute.xlu0 %436  ;;  %v460_v18 = vperm.slane %v440_v5, %v1111_v12 }
 0x11b   : > { %v459_v16 = vperm.slane %v437_v10, %v1111_v12 }
 0x11d   : > { %v467_v19 = vsel %vm466_vm1, %v459_v16, %v458_v17 }
 0x11e   : > { %v469_v23 = vsel %vm468_vm2, %v460_v18, %v467_v19 }
 0x121   : > { %v443_v11 = vpop.permute.xlu1 %442 }
 0x122   : > { %v461_v21 = vperm.slane %v443_v11, %v1111_v12 }
 0x124   : > { %v471_v0 = vsel %vm470_vm3, %v461_v21, %v469_v23 }
 0x125   : > { %v473_v27 = vsel %vm472_vm4, %v462_v25, %v471_v0 }
 0x129   : > { %v449_v22 = vpop.permute.xlu1 %448 }
 0x12a   : > { %v463_v24 = vperm.slane %v449_v22, %v1111_v12 }
 0x12c   : > { %v475_v28 = vsel %vm474_vm5, %v463_v24, %v473_v27 }
 0x12d   : > { %v477_v34 = vsel %vm476_vm6, %v464_v29, %v475_v28 }
 0x131   : > { %v455_v30 = vpop.permute.xlu1 %454 }
 0x132   : > { %v465_v32 = vperm.slane %v455_v30, %v1111_v12 }
 0x134   : > { %v479_v35 = vsel %vm478_vm7, %v465_v32, %v477_v34 }
 0x135   : > { %v482_v37 = vsel %vm481_vm8, %v479_v35, -inf }
 0x136   : > { %483 = vmax.xlane.f32.xlu2 %v482_v37 }
 0x1a9   : > { %v484_v38 = vpop.xlane.xlu2 %483 }
 0x1aa   : > { %v486_v39 = vperm.slane %v484_v38, 0  ;;  %v487_v40 = vperm.slane %v484_v38, 1  ;;  %v489_v41 = vperm.slane %v484_v38, 3  ;;  %v488_v45 = vperm.slane %v484_v38, 2 }
 0x1ab   : > { %v491_v50 = vperm.slane %v484_v38, 5  ;;  %v490_v52 = vperm.slane %v484_v38, 4  ;;  %v492_v5 = vperm.slane %v484_v38, 6 }
 0x1ac   : > { %v503_v43 = vsub.f32 %v417_v56, %v487_v40  ;;  %v502_v44 = vsub.f32 %v416_v55, %v486_v39  ;;  %v505_v48 = vsub.f32 %v419_v58, %v489_v41  ;;  %v504_v49 = vsub.f32 %v1098_v54, %v488_v45 }
 0x1ad   : > { %v507_v61 = vsub.f32 %v421_v63, %v491_v50  ;;  %v506_v55 = vsub.f32 %v1101_v59, %v490_v52  ;;  %v493_v56 = vperm.slane %v484_v38, 7  ;;  %v508_v11 = vsub.f32 %v1104_v62, %v492_v5 }
 0x1ae   : > { %v512_v46 = vmul.f32 1.442695, %v503_v43  ;;  %v510_v47 = vmul.f32 1.442695, %v502_v44  ;;  %v516_v51 = vmul.f32 1.442695, %v505_v48 }
 0x1af   : > { %v514_v53 = vmul.f32 1.442695, %v504_v49  ;;  %v520_v1 = vmul.f32 1.442695, %v507_v61  ;;  %v518_v58 = vmul.f32 1.442695, %v506_v55  ;;  %v509_v54 = vsub.f32 %v1107_v2, %v493_v56 }
 0x1b0   : > { %941 = vpow2.f32 %v512_v46  ;;  %v522_v15 = vmul.f32 1.442695, %v508_v11  ;;  %v349_v2 = vld [vmem:[%s321_s13] sm:$0xff]  ;;  %v891_v46 = vld [vmem:[%s1211_s3 + $0x8] sm:$0xff] }
 0x1b1   : > { %943 = vpow2.f32 %v510_v47  ;;  %v524_v63 = vmul.f32 1.442695, %v509_v54  ;;  %738 = vmatpush.bf16.msra.mxu0 %v891_v46  ;;  %v890_v47 = vld [vmem:[%s1211_s3] sm:$0xff] }
 0x1b2   : > { %945 = vpow2.f32 %v516_v51 }
 0x1b3   : > { %947 = vpow2.f32 %v514_v53 }
 0x1b4   : > { %949 = vpow2.f32 %v520_v1 }
 0x1b5   : > { %951 = vpow2.f32 %v518_v58  ;;  %739 = vmatpush.bf16.msra.mxu0 %v890_v47 }
 0x1b6   : > { %v942_v57 = vpop.eup %941  ;;  %953 = vpow2.f32 %v524_v63 }
 0x1b7   : > { %v944_v60 = vpop.eup %943  ;;  %538 = vperm.xlu0 %938, %v942_v57   ;;  %955 = vpow2.f32 %v522_v15 }
 0x1b8   : > { %535 = vperm.xlu1 %939, %v944_v60   ;;  %v946_v9 = vpop.eup %945 }
 0x1b9   : > { %v948_v10 = vpop.eup %947 }
 0x1ba   : > { %v950_v16 = vpop.eup %949 }
 0x1bb   : > { %v952_v59 = vpop.eup %951 }
 0x1bc   : > { %v954_v17 = vpop.eup %953 }
 0x1bd   : > { %v956_v18 = vpop.eup %955 }
 0x1bf   : > { %544 = vperm.xlu0 %938, %v946_v9  }
 0x1c0   : > { %541 = vperm.xlu1 %939, %v948_v10  }
 0x1c7   : > { %550 = vperm.xlu0 %938, %v950_v16  }
 0x1c8   : > { %547 = vperm.xlu1 %939, %v952_v59  }
 0x1cf   : > { %556 = vperm.xlu0 %938, %v954_v17  }
 0x1d0   : > { %553 = vperm.xlu1 %939, %v956_v18  }
 0x1d7   : > { %747 = vperm.xlu0 %938, %v349_v2  }
 0x229   : > { %v539_v62 = vpop.permute.xlu0 %538 }
 0x22a   : > { %v536_v19 = vpop.permute.xlu1 %535  ;;  %v559_v23 = vperm.slane %v539_v62, %v1111_v12 }
 0x22b   : > { %v558_v0 = vperm.slane %v536_v19, %v1111_v12  ;;  %v585_v48 = vmul.f32 %v894_v6, %v536_v19 }
 0x22d   : > { %v566_v27 = vsel %vm466_vm1, %v559_v23, %v558_v0  ;;  %v593_v6 = vsel %vm382_vm0, %v585_v48, 0.0 }
 0x22e   : > { %v594_v57 = vrot.slane %v593_v6, 4 }
 0x230   : > { %v595_v5 = vadd.f32 %v594_v57, %v593_v6 }
 0x231   : > { %v545_v21 = vpop.permute.xlu0 %544 }
 0x232   : > { %v542_v22 = vpop.permute.xlu1 %541  ;;  %v561_v28 = vperm.slane %v545_v21, %v1111_v12  ;;  %v588_v49 = vmul.f32 %v899_v8, %v545_v21  ;;  %v596_v16 = vrot.slane %v595_v5, 2 }
 0x233   : > { %v560_v24 = vperm.slane %v542_v22, %v1111_v12  ;;  %v587_v50 = vmul.f32 %v898_v7, %v542_v22 }
 0x234   : > { %v614_v8 = vsel %vm382_vm0, %v588_v49, 0.0  ;;  %v597_v22 = vadd.f32 %v596_v16, %v595_v5 }
 0x235   : > { %v567_v29 = vsel %vm468_vm2, %v560_v24, %v566_v27  ;;  %v607_v4 = vsel %vm382_vm0, %v587_v50, 0.0  ;;  %v615_v31 = vrot.slane %v614_v8, 4 }
 0x236   : > { %v568_v34 = vsel %vm470_vm3, %v561_v28, %v567_v29 }
 0x237   : > { %v616_v58 = vadd.f32 %v615_v31, %v614_v8 }
 0x239   : > { %v551_v25 = vpop.permute.xlu0 %550  ;;  %v617_v59 = vrot.slane %v616_v58, 2 }
 0x23a   : > { %v548_v26 = vpop.permute.xlu1 %547  ;;  %v563_v32 = vperm.slane %v551_v25, %v1111_v12  ;;  %v590_v51 = vmul.f32 %v903_v33, %v551_v25 }
 0x23b   : > { %v562_v30 = vperm.slane %v548_v26, %v1111_v12  ;;  %v589_v52 = vmul.f32 %v902_v20, %v548_v26  ;;  %v618_v23 = vadd.f32 %v617_v59, %v616_v58 }
 0x23c   : > { %v628_v7 = vsel %vm382_vm0, %v590_v51, 0.0 }
 0x23d   : > { %v569_v35 = vsel %vm472_vm4, %v562_v30, %v568_v34  ;;  %v621_v33 = vsel %vm382_vm0, %v589_v52, 0.0  ;;  %v629_v60 = vrot.slane %v628_v7, 4  ;;  %v598_v30 = vrot.slane %v597_v22, 1 }
 0x23e   : > { %v570_v41 = vsel %vm474_vm5, %v563_v32, %v569_v35  ;;  %v622_v61 = vrot.slane %v621_v33, 4  ;;  %v619_v32 = vrot.slane %v618_v23, 1 }
 0x23f   : > { %v630_v10 = vadd.f32 %v629_v60, %v628_v7 }
 0x240   : > { %v623_v54 = vadd.f32 %v622_v61, %v621_v33 }
 0x241   : > { %v557_v37 = vpop.permute.xlu0 %556  ;;  %v631_v18 = vrot.slane %v630_v10, 2 }
 0x242   : > { %v565_v38 = vperm.slane %v557_v37, %v1111_v12  ;;  %v554_v39 = vpop.permute.xlu1 %553  ;;  %v592_v53 = vmul.f32 %v907_v42, %v557_v37  ;;  %v624_v2 = vrot.slane %v623_v54, 2 }
 0x243   : > { %v564_v40 = vperm.slane %v554_v39, %v1111_v12  ;;  %v586_v12 = vmul.f32 %v895_v14, %v539_v62  ;;  %v591_v14 = vmul.f32 %v906_v36, %v554_v39  ;;  %v608_v36 = vrot.slane %v607_v4, 4 }
 0x244   : > { %v642_v13 = vsel %vm382_vm0, %v592_v53, 0.0  ;;  %v632_v24 = vadd.f32 %v631_v18, %v630_v10  ;;  %v625_v25 = vadd.f32 %v624_v2, %v623_v54 }
 0x245   : > { %v571_v43 = vsel %vm476_vm6, %v564_v40, %v570_v41  ;;  %v600_v3 = vsel %vm382_vm0, %v586_v12, 0.0  ;;  %v635_v20 = vsel %vm382_vm0, %v591_v14, 0.0  ;;  %v643_v55 = vrot.slane %v642_v13, 4 }
 0x246   : > { %v572_v44 = vsel %vm478_vm7, %v565_v38, %v571_v43  ;;  %v601_v42 = vrot.slane %v600_v3, 4  ;;  %v636_v56 = vrot.slane %v635_v20, 4  ;;  %v609_v9 = vadd.f32 %v608_v36, %v607_v4 }
 0x247   : > { %v574_v45 = vsel %vm481_vm8, %v572_v44, 0.0  ;;  %v644_v11 = vadd.f32 %v643_v55, %v642_v13  ;;  %v633_v35 = vrot.slane %v632_v24, 1  ;;  %v626_v37 = vrot.slane %v625_v25, 1 }
 0x248   : > { %575 = vadd.xlane.f32.xlu1 %v574_v45  ;;  %v602_v1 = vadd.f32 %v601_v42, %v600_v3  ;;  %v637_v63 = vadd.f32 %v636_v56, %v635_v20  ;;  %v610_v17 = vrot.slane %v609_v9, 2  ;;  %v599_v41 = vadd.f32 %v598_v30, %v597_v22 }
 0x249   : > { %v645_v62 = vrot.slane %v644_v11, 2  ;;  %v620_v43 = vadd.f32 %v619_v32, %v618_v23  ;;  %v634_v46 = vadd.f32 %v633_v35, %v632_v24  ;;  %v627_v47 = vadd.f32 %v626_v37, %v625_v25 }
 0x24a   : > { %v603_v15 = vrot.slane %v602_v1, 2  ;;  %v638_v19 = vrot.slane %v637_v63, 2  ;;  %v611_v0 = vadd.f32 %v610_v17, %v609_v9 }
 0x24b   : > { %v646_v26 = vadd.f32 %v645_v62, %v644_v11 }
 0x24c   : > { %v604_v21 = vadd.f32 %v603_v15, %v602_v1  ;;  %v639_v27 = vadd.f32 %v638_v19, %v637_v63  ;;  %v612_v34 = vrot.slane %v611_v0, 1 }
 0x24d   : > { %v647_v38 = vrot.slane %v646_v26, 1 }
 0x24e   : > { %v605_v29 = vrot.slane %v604_v21, 1  ;;  %v640_v39 = vrot.slane %v639_v27, 1  ;;  %v613_v44 = vadd.f32 %v612_v34, %v611_v0 }
 0x24f   : > { %v648_v12 = vadd.f32 %v647_v38, %v646_v26 }
 0x250   : > { %v606_v40 = vadd.f32 %v605_v29, %v604_v21  ;;  %v641_v48 = vadd.f32 %v640_v39, %v639_v27 }
 0x2bb   : > { %v576_v28 = vpop.xlane.xlu1 %575 }
 0x2bc   : > { %957 = vrcp.f32 %v576_v28  ;;  %v748_v28 = vpop.permute.xlu0 %747 }
 0x2c2   : > { %v958_v45 = vpop.eup %957 }
 0x2c3   : > { %v651_v49 = vrot.slane %v958_v45, 1  ;;  %v652_v50 = vrot.slane %v958_v45, 2  ;;  %v653_v51 = vrot.slane %v958_v45, 3  ;;  %v654_v52 = vrot.slane %v958_v45, 4 }
 0x2c4   : > { %v655_v53 = vrot.slane %v958_v45, 5  ;;  %v656_v14 = vrot.slane %v958_v45, 6  ;;  %v657_v3 = vrot.slane %v958_v45, 7  ;;  %v666_v6 = vmul.f32 %v958_v45, %v599_v41 }
 0x2c5   : > { %v667_v8 = vmul.f32 %v651_v49, %v606_v40  ;;  %v668_v4 = vmul.f32 %v652_v50, %v613_v44  ;;  %v669_v7 = vmul.f32 %v653_v51, %v620_v43  ;;  %v670_v33 = vmul.f32 %v654_v52, %v627_v47 }
 0x2c6   : > { %v671_v13 = vmul.f32 %v655_v53, %v634_v46  ;;  %v672_v20 = vmul.f32 %v656_v14, %v641_v48  ;;  %v673_v42 = vmul.f32 %v657_v3, %v648_v12  ;;  %v674_v57 = vpack.c.bf16 %v666_v6, %v666_v6 }
 0x2c7   : > { %v675_v31 = vpack.c.bf16 %v667_v8, %v667_v8  ;;  %v676_v36 = vpack.c.bf16 %v668_v4, %v668_v4  ;;  %v677_v60 = vpack.c.bf16 %v669_v7, %v669_v7  ;;  %v678_v61 = vpack.c.bf16 %v670_v33, %v670_v33 }
 0x2c8   : > { %v679_v55 = vpack.c.bf16 %v671_v13, %v671_v13  ;;  %v680_v56 = vpack.c.bf16 %v672_v20, %v672_v20  ;;  %v681_v1 = vpack.c.bf16 %v673_v42, %v673_v42  ;;  %v694_v54 = vunpack.c.l.b16 %v674_v57 }
 0x2c9   : > { %v695_v5 = vunpack.c.l.b16 %v675_v31  ;;  %v696_v58 = vunpack.c.l.b16 %v676_v36  ;;  %v697_v9 = vunpack.c.l.b16 %v677_v60  ;;  %v698_v10 = vunpack.c.l.b16 %v678_v61 }
 0x2ca   : > { %v699_v11 = vunpack.c.l.b16 %v679_v55  ;;  %v700_v16 = vunpack.c.l.b16 %v680_v56  ;;  %v701_v59 = vunpack.c.l.b16 %v681_v1 }
 0x2cb   : > { %v702_v63 = vrot.slane %v695_v5, 7  ;;  %v704_v15 = vrot.slane %v696_v58, 6  ;;  %v706_v18 = vrot.slane %v697_v9, 5  ;;  %v708_v62 = vrot.slane %v698_v10, 4 }
 0x2cc   : > { %v710_v21 = vrot.slane %v699_v11, 3  ;;  %v712_v23 = vrot.slane %v700_v16, 2  ;;  %v714_v24 = vrot.slane %v701_v59, 1 }
 0x2cd   : > { %v703_v17 = vsel %vm466_vm1, %v702_v63, %v694_v54 }
 0x2ce   : > { %v705_v2 = vsel %vm468_vm2, %v704_v15, %v703_v17 }
 0x2cf   : > { %v707_v19 = vsel %vm470_vm3, %v706_v18, %v705_v2 }
 0x2d0   : > { %v709_v22 = vsel %vm472_vm4, %v708_v62, %v707_v19 }
 0x2d1   : > { %v711_v0 = vsel %vm474_vm5, %v710_v21, %v709_v22 }
 0x2d2   : > { %v713_v25 = vsel %vm476_vm6, %v712_v23, %v711_v0 }
 0x2d3   : > { %v715_v26 = vsel %vm478_vm7, %v714_v24, %v713_v25 }
 0x2d4   : > { %v716_v27 = vpack.c.b16 %v715_v26, %v715_v26 }
 0x2d6   : > { %886 = vmatmul.msk.bf16.vlgmr.msra.gmra.mxu0 %vm382_vm0, %v716_v27 }
 0x353   : > { %v741_v29 = vpop.f32.mrf.mxu0 }
 0x354   : > { %v750_v30 = vmul.f32 %v748_v28, %v741_v29 }
 0x356   : > { %751 = vst.msk [vmem:[%s328_s24] sm:$0xff] %vm382_vm0, %v750_v30 }
 0x35b   : > { %v743_v32 = vpop.f32.mrf.mxu0 }
 0x35c PF: > { %s15_s20 = sadd.s32 1, %s981_s20   ;;  %s1214_s18 = smov %s977_s19 }
 0x35d   : > { %p12_p5 = scmp.ge.s32.totalorder %s15_s20, 4   ;;  %s1215_s19 = smov %s1217_s21 }
 0x35f   :  { %14 = sbr.rel (!%p12_p5) target bundleno = 2 (0x2), region = 79 }

// kernel: _lambda_.5
= control target key start
LH: loop header
LB: loop body
LE: loop exit
PB: predicated region body
PF: predicated region fallthrough
CT: control target
= control target key end

     0   :  { %12 = vsyncpa [#allocation3], 0  ;;  %s1423_s0 = inlined_call_operand.vmem [shape: bf16[2,64,32], index: 0, kind: input, shape index: {}]   ;;  %s1424_s1 = inlined_call_operand.vmem [shape: bf16[32,16], index: 1, kind: input, shape index: {}]   ;;  %s1425_s2 = inlined_call_operand.vmem [shape: bf16[2,8,16], index: 2, kind: input, shape index: {}]   ;;  %s1426_s3 = inlined_call_operand.vmem [shape: bf16[2,8,16], index: 3, kind: input, shape index: {}]   ;;  %s1427_s4 = inlined_call_operand.vmem [shape: f32[2,1,8], index: 4, kind: input, shape index: {}]   ;;  %s1428_s5 = inlined_call_operand.vmem [shape: bf16[16,32], index: 5, kind: input, shape index: {}]   ;;  %s1429_s6 = inlined_call_operand.vmem [shape: f32[2,64,1], index: 6, kind: input, shape index: {}]   ;;  %s1430_s7 = inlined_call_operand.hbm [shape: f32[2,64,32], index: 7, kind: output, shape index: {}]  }
   0x1   :  { %14 = vsyncpa [#allocation3 + $0x1], 0  ;;  %s1225_s24 = smov 0   ;;  %s1227_s25 = smov 0  }
   0x2   :  { %s1229_s26 = smov 0   ;;  %s1231_s27 = smov 0  }
   0x3   :  { %s1233_s28 = smov 0   ;;  %s1235_s29 = smov 0  }
   0x4 LB: > { %s937_s30 = sadd.s32 4294967295, %s1180_s29   ;;  %s938_s8 = sadd.s32 4294967294, %s1180_s29   ;;  %s1180_s29 = sphi %s1235_s29, %s20_s29   ;;  %s1176_s28 = sphi %s1233_s28, %s1437_s28   ;;  %s1172_s27 = sphi %s1231_s27, %s1436_s27   ;;  %s1168_s26 = sphi %s1229_s26, %s1435_s26   ;;  %s1164_s25 = sphi %s1227_s25, %s1434_s25   ;;  %s1160_s24 = sphi %s1225_s24, %s1433_s24  }
   0x5   : > { %s32_s9 = sadd.s32 1, %s1176_s28  ;;  %s217_s10 = sadd.s32 1, %s1168_s26 }
   0x6   : > { %p34_p0 = scmp.ge.s32.totalorder %s32_s9, 2  ;;  %p227_p1 = scmp.ne.s32.totalorder %s1168_s26, %s1164_s25 }
   0x7   : > { %p228_p2 = scmp.eq.s32.totalorder %s937_s30, 1  ;;  %p233_p3 = scmp.ne.s32.totalorder %s1164_s25, %s1160_s24 }
   0x8   : > { %s1439_s9 = smov (%p34_p0, %s32_s9), 0  ;;  %p234_p5 = scmp.eq.s32.totalorder %s938_s8, 1 }
   0x9   : > { %p1265_p4 = por %p228_p2, %p227_p1  ;;  %s212_s12 = ssub.s32 %s1176_s28, %s1439_s9 }
   0xa   : > { %p941_p6 = scmp.ge.s32.totalorder %s1180_s29, 1  ;;  %p215_p7 = scmp.eq.s32.totalorder %s212_s12, 0 }
   0xb   : > { %p1272_p8 = por %p234_p5, %p233_p3  ;;  %p304_p9 = scmp.lt.s32.totalorder %s1180_s29, 3 }
   0xc   : > { %s1278_s14 = scalar_select %p215_p7, %s1168_s26, %s217_s10  }
   0xd   : > { %p305_p10 = pnand %p941_p6, %p304_p9 }
   0xe   : > { %p361_p11 = scmp.lt.s32.totalorder (!%p305_p10), %s1172_s27, 1 }
   0xf   : > { %308 = sbr.rel (%p305_p10) target bundleno = 768 (0x300), region = 48 }
  0x14   : > { %v1005_v0 = vld [vmem:[%s1424_s1 + $0x8] sm:$0xff]  ;;  %v1004_v1 = vld [vmem:[%s1424_s1] sm:$0xff]  ;;  %s1288_s19 = scalar_select %p361_p11, %s1172_s27, 1  ;;  %vm448_vm0 = vcmask 261120   ;;  %vm497_vm1 = vcmask 130048   ;;  %vm542_vm2 = vcmask 64512  }
  0x15   : > { %467 = vmatpush.bf16.msra.mxu0 %v1005_v0  ;;  %vm631_vm3 = vcmask 1043456  }
  0x16   : > { %s998_s20 = sshll.u32 %s1288_s19, 5  ;;  %s380_s10 = scalar_lea.vmem %s1427_s4, %s1288_s19 }
  0x17   : > { %s368_s23 = scalar_lea.vmem %s1423_s0, %s998_s20  ;;  %s945_s12 = sshll.u32 %s1288_s19, 2  ;;  %v1069_v20 = vld [vmem:[%s380_s10] ss:$0 sm:$0xff] }
  0x18   : > { %v1000_v2 = vld [vmem:[%s368_s23] sm:$0xff]  ;;  %v1001_v3 = vld [vmem:[%s368_s23 + $0x8] sm:$0xff]  ;;  %v1002_v4 = vld [vmem:[%s368_s23 + $0x10] sm:$0xff]  ;;  %s373_s17 = scalar_lea.vmem %s1425_s2, %s945_s12  ;;  %s377_s21 = scalar_lea.vmem %s1426_s3, %s945_s12 }
  0x19   : > { %468 = vmatpush.bf16.msra.mxu0 %v1004_v1  ;;  %v1003_v5 = vld [vmem:[%s368_s23 + $0x18] sm:$0xff]  ;;  %v401_v6 = vld [vmem:[%s373_s17] sm:$0xf]  ;;  %s999_s30 = sshll.u32 %s1288_s19, 6  ;;  %s357_s19 = sand.u32 1, %s1164_s25  }
  0x1a   : > { %v511_v7 = vsel %vm497_vm1, %v401_v6, 0  ;;  %v402_v45 = vld [vmem:[%s377_s21] sm:$0xf]  ;;  %s1349_s12 = scalar_lea.vmem %s1429_s6, %s999_s30  ;;  %s942_s15 = sshll.u32 %s357_s19, 6 }
  0x1b   : > { %520 = vmatpush.bf16.xpose.msra.mxu1 %v511_v7  ;;  %v633_v46 = vsel %vm631_vm3, %v402_v45, 0  ;;  %s1366_s16 = scalar_lea.vmem [#allocation2], %s942_s15  ;;  %s1007_s17 = sshll.u32 %s1172_s27, 6 }
  0x1c   : > { %973 = vmatmul.msk.bf16.vlgmr.msra.gmra.mxu0 %vm448_vm0, %v1000_v2  ;;  %642 = vmatpush.bf16.msra.mxu2 %v633_v46  ;;  %s803_s21 = scalar_lea.hbm %s1430_s7, %s1007_s17  ;;  %s804_s22 = sshll.u32 %s1366_s16, 4  ;;  %s805_s22 = int_to_ptr.vmem [resolvable:$true] %s804_s22 }
  0x1d   : > { %s806_s23 = sshll.u32 %s803_s21, 4  ;;  %s790_s27 = scalar_lea.sflag [#allocation3], %s357_s19  ;;  %s807_s23 = int_to_ptr.hbm [resolvable:$true] %s806_s23 }
  0x1e   : > { %s1116_s30 = sshra.s32 %s807_s23, 4  ;;  %s1122_s15 = scalar_lea.hbm %s1430_s7, 128  ;;  %s1117_s30 = int_to_ptr.hbm [resolvable:$true] %s1116_s30 }
  0x1f   : > { %s1118_s8 = scalar_lea.hbm %s1117_s30, 64  ;;  %p1123_p1 = scmp.lt.s32.totalorder %s1117_s30, %s1430_s7 }
  0x20   : > { %p1119_p12 = scmp.ne.s32.totalorder %s1117_s30, %s1118_s8  ;;  %p1124_p2 = scmp.lt.s32.totalorder %s1122_s15, %s1118_s8 }
  0x22   : > { %p1120_p13 = pnand %p1119_p12, %p1265_p4  ;;  %p1125_p3 = por %p1124_p2, %p1123_p1 }
  0x24   : > { %p1121_p0 = pneg %p1120_p13 }
  0x26   : > { %p1126_p5 = pnand %p1125_p3, %p1121_p0 }
  0x2c   : > { %974 = vmatmul.msk.bf16.gmra.mxu0 %vm448_vm0, %v1001_v3 }
  0x3c   : > { %975 = vmatmul.msk.bf16.gmra.mxu0 %vm448_vm0, %v1002_v4 }
  0x4c   : > { %976 = vmatmul.msk.bf16.gmra.mxu0 %vm448_vm0, %v1003_v5 }
  0x99   : > { %v470_v8 = vpop.f32.mrf.mxu0 }
  0xa1   : > { %v472_v9 = vpop.f32.mrf.mxu0 }
  0xa2   : > { %v490_v10 = vpack.c.bf16 %v472_v9, %v470_v8 }
  0xa4   : > { %977 = vmatmul.msk.bf16.vlgmr.msra.gmra.mxu1 %vm497_vm1, %v490_v10 }
  0xa9   : > { %v475_v11 = vpop.f32.mrf.mxu0 }
  0xb1   : > { %v477_v12 = vpop.f32.mrf.mxu0 }
  0xb2   : > { %v491_v13 = vpack.c.bf16 %v477_v12, %v475_v11 }
  0xb4   : > { %978 = vmatmul.msk.bf16.gmra.mxu1 %vm497_vm1, %v491_v13 }
  0xb9   : > { %v480_v14 = vpop.f32.mrf.mxu0 }
  0xc1   : > { %v482_v15 = vpop.f32.mrf.mxu0 }
  0xc2   : > { %v492_v16 = vpack.c.bf16 %v482_v15, %v480_v14 }
  0xc4   : > { %979 = vmatmul.msk.bf16.gmra.mxu1 %vm497_vm1, %v492_v16 }
  0xc9   : > { %v485_v17 = vpop.f32.mrf.mxu0 }
  0xd1   : > { %v487_v18 = vpop.f32.mrf.mxu0 }
  0xd2   : > { %v493_v19 = vpack.c.bf16 %v487_v18, %v485_v17 }
  0xd4   : > { %980 = vmatmul.msk.bf16.gmra.mxu1 %vm497_vm1, %v493_v19 }
 0x121   : > { %v522_v21 = vpop.f32.mrf.mxu1 }
 0x122   : > { %v523_v22 = vadd.f32 %v1069_v20, %v522_v21 }
 0x124   : > { %v543_v23 = vsel %vm542_vm2, %v523_v22, -inf }
 0x125   : > { %544 = vmax.xlane.f32.xlu0 %v543_v23 }
 0x129   : > { %v524_v24 = vpop.f32.mrf.mxu1 }
 0x12a   : > { %v525_v25 = vadd.f32 %v1069_v20, %v524_v24 }
 0x12c   : > { %v546_v26 = vsel %vm542_vm2, %v525_v25, -inf }
 0x12d   : > { %547 = vmax.xlane.f32.xlu0 %v546_v26 }
 0x131   : > { %v527_v27 = vpop.f32.mrf.mxu1 }
 0x132   : > { %v528_v28 = vadd.f32 %v1069_v20, %v527_v27  ;;  %v1006_v27 = vld [vmem:[%s1428_s5] sm:$0xff] }
 0x133   : > { %711 = vmatpush.bf16.msra.mxu3 %v1006_v27 }
 0x134   : > { %v549_v29 = vsel %vm542_vm2, %v528_v28, -inf }
 0x135   : > { %550 = vmax.xlane.f32.xlu1 %v549_v29  ;;  %v404_v29 = vld [vmem:[%s1349_s12] sm:$0xff] }
 0x139   : > { %v529_v30 = vpop.f32.mrf.mxu1 }
 0x13a   : > { %v530_v31 = vadd.f32 %v1069_v20, %v529_v30 }
 0x13c   : > { %v552_v32 = vsel %vm542_vm2, %v530_v31, -inf }
 0x13d   : > { %553 = vmax.xlane.f32.xlu1 %v552_v32 }
 0x141   : > { %v532_v33 = vpop.f32.mrf.mxu1 }
 0x142   : > { %v533_v34 = vadd.f32 %v1069_v20, %v532_v33 }
 0x144   : > { %v555_v35 = vsel %vm542_vm2, %v533_v34, -inf }
 0x145   : > { %556 = vmax.xlane.f32.xlu2 %v555_v35 }
 0x149   : > { %v534_v36 = vpop.f32.mrf.mxu1 }
 0x14a   : > { %v535_v37 = vadd.f32 %v1069_v20, %v534_v36 }
 0x14c   : > { %v558_v38 = vsel %vm542_vm2, %v535_v37, -inf }
 0x14d   : > { %559 = vmax.xlane.f32.xlu2 %v558_v38 }
 0x151   : > { %v537_v39 = vpop.f32.mrf.mxu1 }
 0x152   : > { %v538_v40 = vadd.f32 %v1069_v20, %v537_v39  ;;  %v406_v39 = vld [vmem:[%s1349_s12 + $0x10] sm:$0xff] }
 0x154   : > { %v561_v41 = vsel %vm542_vm2, %v538_v40, -inf }
 0x155   : > { %562 = vmax.xlane.f32.xlu0 %v561_v41 }
 0x159   : > { %v539_v42 = vpop.f32.mrf.mxu1 }
 0x15a   : > { %v1320_v43 = vadd.f32 %v1069_v20, %v539_v42 }
 0x15c   : > { %v564_v44 = vsel %vm542_vm2, %v1320_v43, -inf }
 0x15d   : > { %565 = vmax.xlane.f32.xlu1 %v564_v44 }
 0x198   : > { %v545_v47 = vpop.xlane.xlu0 %544 }
 0x199   : > { %v567_v48 = vsub.f32 %v523_v22, %v545_v47 }
 0x19b   : > { %v575_v49 = vmul.f32 1.442695, %v567_v48 }
 0x19d   : > { %1070 = vpow2.f32 %v575_v49  ;;  %v408_v49 = vld [vmem:[%s1349_s12 + $0x20] sm:$0xff] }
 0x1a0   : > { %v548_v50 = vpop.xlane.xlu0 %547 }
 0x1a1   : > { %v568_v51 = vsub.f32 %v525_v25, %v548_v50  ;;  %v405_v50 = vld [vmem:[%s1349_s12 + $0x8] sm:$0xff] }
 0x1a3   : > { %v1071_v52 = vpop.eup %1070  ;;  %v577_v53 = vmul.f32 1.442695, %v568_v51 }
 0x1a4   : > { %v591_v54 = vsel %vm542_vm2, %v1071_v52, 0.0 }
 0x1a5   : > { %1072 = vpow2.f32 %v577_v53  ;;  %592 = vadd.xlane.f32.xlu2 %v591_v54  ;;  %v410_v54 = vld [vmem:[%s1349_s12 + $0x30] sm:$0xff] }
 0x1a8   : > { %v551_v55 = vpop.xlane.xlu1 %550 }
 0x1a9   : > { %v569_v56 = vsub.f32 %v528_v28, %v551_v55  ;;  %v1182_v28 = vmov 0   ;;  %v407_v55 = vld [vmem:[%s1349_s12 + $0x18] sm:$0xff] }
 0x1aa   : > { %1066 = vset.pattern.permute.xlu1 %v1182_v28  ;;  %1068 = vset.pattern.permute.xlu0 %v1182_v28 }
 0x1ab   : > { %v1073_v57 = vpop.eup %1072  ;;  %v579_v58 = vmul.f32 1.442695, %v569_v56  ;;  %1067 = vset.pattern.permute.xlu2 %v1182_v28 }
 0x1ac   : > { %v594_v59 = vsel %vm542_vm2, %v1073_v57, 0.0  ;;  %v615_v60 = vpack.c.bf16 %v1073_v57, %v1071_v52 }
 0x1ad   : > { %1074 = vpow2.f32 %v579_v58  ;;  %595 = vadd.xlane.f32.xlu0 %v594_v59 }
 0x1ae   : > { %981 = vmatmul.msk.bf16.vlgmr.msra.gmra.mxu2 %vm542_vm2, %v615_v60 }
 0x1b0   : > { %v554_v61 = vpop.xlane.xlu1 %553 }
 0x1b1   : > { %v570_v62 = vsub.f32 %v530_v31, %v554_v61 }
 0x1b3   : > { %v1075_v63 = vpop.eup %1074  ;;  %v581_v0 = vmul.f32 1.442695, %v570_v62  ;;  %v409_v62 = vld [vmem:[%s1349_s12 + $0x28] sm:$0xff] }
 0x1b4   : > { %v597_v1 = vsel %vm542_vm2, %v1075_v63, 0.0 }
 0x1b5   : > { %1076 = vpow2.f32 %v581_v0  ;;  %598 = vadd.xlane.f32.xlu1 %v597_v1 }
 0x1b8   : > { %v557_v2 = vpop.xlane.xlu2 %556 }
 0x1b9   : > { %v571_v3 = vsub.f32 %v533_v34, %v557_v2  ;;  %v411_v2 = vld [vmem:[%s1349_s12 + $0x38] sm:$0xff] }
 0x1bb   : > { %v1077_v4 = vpop.eup %1076  ;;  %v583_v5 = vmul.f32 1.442695, %v571_v3 }
 0x1bc   : > { %v600_v6 = vsel %vm542_vm2, %v1077_v4, 0.0  ;;  %v616_v7 = vpack.c.bf16 %v1077_v4, %v1075_v63 }
 0x1bd   : > { %1078 = vpow2.f32 %v583_v5  ;;  %601 = vadd.xlane.f32.xlu2 %v600_v6 }
 0x1be   : > { %982 = vmatmul.msk.bf16.gmra.mxu2 %vm542_vm2, %v616_v7 }
 0x1c0   : > { %v560_v8 = vpop.xlane.xlu2 %559 }
 0x1c1   : > { %v572_v9 = vsub.f32 %v535_v37, %v560_v8 }
 0x1c3   : > { %v1079_v10 = vpop.eup %1078  ;;  %v585_v11 = vmul.f32 1.442695, %v572_v9 }
 0x1c4   : > { %v603_v12 = vsel %vm542_vm2, %v1079_v10, 0.0 }
 0x1c5   : > { %1080 = vpow2.f32 %v585_v11  ;;  %604 = vadd.xlane.f32.xlu0 %v603_v12 }
 0x1c8   : > { %v563_v13 = vpop.xlane.xlu0 %562 }
 0x1c9   : > { %v573_v14 = vsub.f32 %v538_v40, %v563_v13 }
 0x1cb   : > { %v1081_v15 = vpop.eup %1080  ;;  %v587_v16 = vmul.f32 1.442695, %v573_v14 }
 0x1cc   : > { %v606_v17 = vsel %vm542_vm2, %v1081_v15, 0.0  ;;  %v617_v18 = vpack.c.bf16 %v1081_v15, %v1079_v10 }
 0x1cd   : > { %1082 = vpow2.f32 %v587_v16  ;;  %607 = vadd.xlane.f32.xlu1 %v606_v17 }
 0x1ce   : > { %983 = vmatmul.msk.bf16.gmra.mxu2 %vm542_vm2, %v617_v18 }
 0x1d0   : > { %v566_v19 = vpop.xlane.xlu1 %565 }
 0x1d1   : > { %v574_v20 = vsub.f32 %v1320_v43, %v566_v19 }
 0x1d3   : > { %v1083_v21 = vpop.eup %1082  ;;  %v589_v22 = vmul.f32 1.442695, %v574_v20 }
 0x1d4   : > { %v609_v23 = vsel %vm542_vm2, %v1083_v21, 0.0 }
 0x1d5   : > { %1084 = vpow2.f32 %v589_v22  ;;  %610 = vadd.xlane.f32.xlu2 %v609_v23 }
 0x1db   : > { %v1085_v24 = vpop.eup %1084 }
 0x1dc   : > { %v612_v25 = vsel %vm542_vm2, %v1085_v24, 0.0  ;;  %v618_v26 = vpack.c.bf16 %v1085_v24, %v1083_v21 }
 0x1dd   : > { %613 = vadd.xlane.f32.xlu0 %v612_v25 }
 0x1de   : > { %984 = vmatmul.msk.bf16.gmra.mxu2 %vm542_vm2, %v618_v26 }
 0x1e6   : > { %735 = vperm.xlu1 %1066, %v404_v29  }
 0x1ed   : > { %740 = vperm.xlu2 %1067, %v405_v50  }
 0x1ee   : > { %755 = vperm.xlu1 %1066, %v408_v49  }
 0x1f1   : > { %745 = vperm.xlu0 %1068, %v406_v39  }
 0x1f5   : > { %750 = vperm.xlu2 %1067, %v407_v55  }
 0x1f6   : > { %765 = vperm.xlu1 %1066, %v410_v54  }
 0x1fd   : > { %760 = vperm.xlu2 %1067, %v409_v62  }
 0x205   : > { %770 = vperm.xlu2 %1067, %v411_v2  }
 0x218   : > { %v593_v30 = vpop.xlane.xlu2 %592 }
 0x219   : > { %1086 = vrcp.f32 %v593_v30 }
 0x21f   : > { %v1087_v33 = vpop.eup %1086 }
 0x220   : > { %v596_v31 = vpop.xlane.xlu0 %595 }
 0x221   : > { %1088 = vrcp.f32 %v596_v31 }
 0x227   : > { %v1089_v34 = vpop.eup %1088 }
 0x228   : > { %v599_v40 = vpop.xlane.xlu1 %598 }
 0x229   : > { %1090 = vrcp.f32 %v599_v40 }
 0x22f   : > { %v1091_v43 = vpop.eup %1090 }
 0x230   : > { %v602_v41 = vpop.xlane.xlu2 %601 }
 0x231   : > { %v644_v32 = vpop.f32.mrf.mxu2  ;;  %1092 = vrcp.f32 %v602_v41 }
 0x232   : > { %v672_v36 = vmul.f32 %v1087_v33, %v644_v32 }
 0x237   : > { %v1093_v44 = vpop.eup %1092 }
 0x238   : > { %v605_v51 = vpop.xlane.xlu0 %604 }
 0x239   : > { %v646_v35 = vpop.f32.mrf.mxu2  ;;  %1094 = vrcp.f32 %v605_v51 }
 0x23a   : > { %v673_v37 = vmul.f32 %v1089_v34, %v646_v35 }
 0x23c   : > { %v680_v38 = vpack.c.bf16 %v673_v37, %v672_v36 }
 0x23e   : > { %989 = vmatmul.msk.bf16.vlgmr.msra.gmra.mxu3 %vm497_vm1, %v680_v38 }
 0x23f   : > { %v1095_v56 = vpop.eup %1094 }
 0x240   : > { %v608_v52 = vpop.xlane.xlu1 %607 }
 0x241   : > { %v649_v42 = vpop.f32.mrf.mxu2  ;;  %1096 = vrcp.f32 %v608_v52 }
 0x242   : > { %v674_v46 = vmul.f32 %v1091_v43, %v649_v42 }
 0x247   : > { %v1097_v57 = vpop.eup %1096 }
 0x248   : > { %v611_v63 = vpop.xlane.xlu2 %610 }
 0x249   : > { %v651_v45 = vpop.f32.mrf.mxu2  ;;  %1098 = vrcp.f32 %v611_v63 }
 0x24a   : > { %v675_v47 = vmul.f32 %v1093_v44, %v651_v45 }
 0x24c   : > { %v681_v48 = vpack.c.bf16 %v675_v47, %v674_v46 }
 0x24e   : > { %990 = vmatmul.msk.bf16.gmra.mxu3 %vm497_vm1, %v681_v48 }
 0x24f   : > { %v1099_v3 = vpop.eup %1098 }
 0x250   : > { %v614_v0 = vpop.xlane.xlu0 %613  ;;  %v741_v12 = vpop.permute.xlu2 %740 }
 0x251   : > { %v654_v53 = vpop.f32.mrf.mxu2  ;;  %1100 = vrcp.f32 %v614_v0 }
 0x252   : > { %v676_v59 = vmul.f32 %v1095_v56, %v654_v53 }
 0x257   : > { %v1101_v4 = vpop.eup %1100 }
 0x258   : > { %v736_v9 = vpop.permute.xlu1 %735  ;;  %v751_v18 = vpop.permute.xlu2 %750 }
 0x259   : > { %v656_v58 = vpop.f32.mrf.mxu2 }
 0x25a   : > { %v677_v60 = vmul.f32 %v1097_v57, %v656_v58 }
 0x25c   : > { %v682_v61 = vpack.c.bf16 %v677_v60, %v676_v59 }
 0x25e   : > { %991 = vmatmul.msk.bf16.gmra.mxu3 %vm497_vm1, %v682_v61 }
 0x260   : > { %v756_v21 = vpop.permute.xlu1 %755  ;;  %v761_v24 = vpop.permute.xlu2 %760 }
 0x261   : > { %v659_v1 = vpop.f32.mrf.mxu2 }
 0x262   : > { %v678_v6 = vmul.f32 %v1099_v3, %v659_v1 }
 0x263   : > { %v746_v15 = vpop.permute.xlu0 %745 }
 0x268   : > { %v766_v27 = vpop.permute.xlu1 %765  ;;  %v771_v30 = vpop.permute.xlu2 %770 }
 0x269   : > { %v661_v5 = vpop.f32.mrf.mxu2 }
 0x26a   : > { %v679_v7 = vmul.f32 %v1101_v4, %v661_v5 }
 0x26c   : > { %v683_v8 = vpack.c.bf16 %v679_v7, %v678_v6 }
 0x26e   : > { %992 = vmatmul.msk.bf16.gmra.mxu3 %vm497_vm1, %v683_v8 }
 0x2c1   : > { %v713_v10 = vpop.f32.mrf.mxu3 }
 0x2c2   : > { %v773_v11 = vmul.f32 %v736_v9, %v713_v10 }
 0x2c4   : > { %781 = vst.msk [vmem:[%s1366_s16] sm:$0xff] %vm448_vm0, %v773_v11 }
 0x2c9   : > { %v715_v13 = vpop.f32.mrf.mxu3 }
 0x2ca   : > { %v774_v14 = vmul.f32 %v741_v12, %v715_v13 }
 0x2cc   : > { %782 = vst.msk [vmem:[%s1366_s16 + $0x8] sm:$0xff] %vm448_vm0, %v774_v14 }
 0x2d1   : > { %v718_v16 = vpop.f32.mrf.mxu3 }
 0x2d2   : > { %v775_v17 = vmul.f32 %v746_v15, %v718_v16 }
 0x2d4   : > { %783 = vst.msk [vmem:[%s1366_s16 + $0x10] sm:$0xff] %vm448_vm0, %v775_v17 }
 0x2d9   : > { %v720_v19 = vpop.f32.mrf.mxu3 }
 0x2da   : > { %v776_v20 = vmul.f32 %v751_v18, %v720_v19 }
 0x2dc   : > { %784 = vst.msk [vmem:[%s1366_s16 + $0x18] sm:$0xff] %vm448_vm0, %v776_v20 }
 0x2e1   : > { %v723_v22 = vpop.f32.mrf.mxu3 }
 0x2e2   : > { %v777_v23 = vmul.f32 %v756_v21, %v723_v22 }
 0x2e4   : > { %785 = vst.msk [vmem:[%s1366_s16 + $0x20] sm:$0xff] %vm448_vm0, %v777_v23 }
 0x2e9   : > { %v725_v25 = vpop.f32.mrf.mxu3 }
 0x2ea   : > { %v778_v26 = vmul.f32 %v761_v24, %v725_v25 }
 0x2ec   : > { %786 = vst.msk [vmem:[%s1366_s16 + $0x28] sm:$0xff] %vm448_vm0, %v778_v26 }
 0x2f1   : > { %v728_v28 = vpop.f32.mrf.mxu3 }
 0x2f2   : > { %v779_v29 = vmul.f32 %v766_v27, %v728_v28 }
 0x2f4   : > { %787 = vst.msk [vmem:[%s1366_s16 + $0x30] sm:$0xff] %vm448_vm0, %v779_v29 }
 0x2f9   : > { %v730_v31 = vpop.f32.mrf.mxu3 }
 0x2fa   : > { %v780_v32 = vmul.f32 %v771_v30, %v730_v31 }
 0x2fc   : > { %788 = vst.msk [vmem:[%s1366_s16 + $0x38] sm:$0xff] %vm448_vm0, %v780_v32 }
 0x2fd   : > { %1129 = shalt.err (!%p1126_p5)
}
 0x2fe   : > { %s1183_s19 = smov 128   ;;  %s1184_s16 = smov 8  }
 0x2ff   : > { %1008 = dma.vmem_to_hbm [thread:$0]  (%p1265_p4), %s805_s22, 1024, %s807_s23, %s790_s27, %s1183_s19, %s1183_s19, %s1184_s16  }
 0x300 PF: > { %p1014_p6 = scmp.ge.s32.totalorder %s1180_s29, 2  ;;  %s821_s20 = sand.u32 1, %s1160_s24  }
 0x301   : > { %s822_s21 = scalar_lea.sflag [#allocation3], %s821_s20 }
 0x302   : > { %p1011_p7 = pnand %p1014_p6, %p1272_p8 }
 0x304   : > { %p1012_p9 = pneg %p1011_p7 }
 0x306   : > { %1155 = dma.done.wait (%p1012_p9), %s822_s21, 1024  }
 0x307   : > { %1157 = vsyncadd (%p1012_p9), %s822_s21, 4294966272  ;;  %s20_s29 = sadd.s32 1, %s1180_s29   ;;  %s1433_s24 = smov %s1164_s25 }
 0x308   : > { %p17_p10 = scmp.ge.s32.totalorder %s20_s29, 4   ;;  %s1434_s25 = smov %s1168_s26 }
 0x309   : > { %s1435_s26 = smov %s1278_s14  ;;  %s1436_s27 = smov %s1176_s28 }
 0x30a   : > { %s1437_s28 = smov %s1439_s9  ;;  %19 = sbr.rel (!%p17_p10) target bundleno = 4 (0x4), region = 95 }
 0x30f   :  { %828 = vsyncpa [#allocation3], 1 }
 0x310   :  { %830 = vsyncpa [#allocation3 + $0x1], 1 }

</bundles_post_ra>
